<compile_context>
chip_gen: v7x
topology: tpu7x:2x2x1
jax: 0.10.0
libtpu: 0.0.40
codegen_flags: <defaults>
</compile_context>

<pallas_src>
import functools

import numpy as np
import jax
import jax.numpy as jnp
from jax.experimental import pallas as pl
from jax.experimental.pallas import tpu as pltpu

# ---- small, deterministic hyper-params consistent with the module __init__ ----
C_IN = 4              # input channels
C = 8                 # starting model channels
STEM_MULT = 4         # stem_multiplier
C0 = STEM_MULT * C    # channels after stem (32)
N_CLASSES = 10
NC_PAD = 128          # classifier columns padded to a lane-dense 128
N_BIG_NODES = 2       # n_big_nodes
WINDOW = 3            # slide_window
K_IM2COL = 9 * C_IN   # 36 -- NOT padded to 128 in HBM


# ------------------------------ Pallas kernel --------------------------------

def fused_net_kernel(mixw_ref, xcol_ref,
                     stem_w_ref, stem_s_ref, stem_b_ref,
                     dag1_w_ref, dag1_s_ref, dag1_b_ref,
                     sel1_ref, red1_w_ref, red1_s_ref, red1_b_ref,
                     dag2_w_ref, dag2_s_ref, dag2_b_ref,
                     sel2_ref, red2_w_ref, red2_s_ref, red2_b_ref,
                     dag3_w_ref, dag3_s_ref, dag3_b_ref,
                     lin_w_ref, lin_b_ref, o_ref,
                     *, n_nodes, window):
    """Whole network for ONE image per grid step.

    Every intermediate (stem output, DAG states, reduction features, pooled
    feature) stays in vregs/VMEM; only the (1, 128) padded logits row is
    stored to HBM.
    """
    # DAG mix weights (shared by all three bigDAGs in the Share variant):
    # hoist the SMEM scalar reads once, off the hot path.
    mixw = [[mixw_ref[i, j] for j in range(window)] for i in range(n_nodes)]

    def big_dag(s, w_ref, sc_ref, sh_ref):
        # Each node:  mixed = sum_j alpha[i,j] * state_j   (f32 VPU)
        #             node  = BN(1x1conv(ReLU(mixed)))     (bf16 MXU, f32 acc)
        states = [s, s]                                  # (s0, s1)
        for i in range(n_nodes):
            k = min(window, len(states))
            cand = states[-k:]                           # slide window, oldest->newest
            mixed = cand[0] * mixw[i][0]
            for j in range(1, k):
                mixed = mixed + cand[j] * mixw[i][j]
            h = jnp.maximum(mixed, 0.0).astype(jnp.bfloat16)
            node = jnp.dot(h, w_ref[i], preferred_element_type=jnp.float32)
            node = node * sc_ref[i] + sh_ref[i]          # folded eval-mode BN
            states.append(node)
        return states[-1]

    def reduction(s, sel_ref, w_ref, sc_ref, sh_ref):
        # stride-2 subsample as a 0/1 row-selection matmul (no strided slices
        # / relayouts), then ReLU -> 1x1 conv (channels x2) -> BN.
        ds = jnp.dot(sel_ref[...], s.astype(jnp.bfloat16),
                     preferred_element_type=jnp.float32)
        h = jnp.maximum(ds, 0.0).astype(jnp.bfloat16)
        out = jnp.dot(h, w_ref[...], preferred_element_type=jnp.float32)
        return out * sc_ref[...] + sh_ref[...]

    # --- stem: 3x3 conv (im2col'd, K = 36) + BN ------------------------------
    s = jnp.dot(xcol_ref[...], stem_w_ref[...],
                preferred_element_type=jnp.float32)
    s = s * stem_s_ref[...] + stem_b_ref[...]

    # --- bigDAG1 -> reduce1 -> bigDAG2 -> reduce2 -> bigDAG3 -----------------
    s = big_dag(s, dag1_w_ref, dag1_s_ref, dag1_b_ref)
    s = reduction(s, sel1_ref, red1_w_ref, red1_s_ref, red1_b_ref)
    s = big_dag(s, dag2_w_ref, dag2_s_ref, dag2_b_ref)
    s = reduction(s, sel2_ref, red2_w_ref, red2_s_ref, red2_b_ref)
    s = big_dag(s, dag3_w_ref, dag3_s_ref, dag3_b_ref)

    # --- global-avg-pool + linear classifier epilogue ------------------------
    feat = jnp.sum(s, axis=0, keepdims=True) * (1.0 / s.shape[0])   # (1, 4*C0)
    logits = jnp.dot(feat.astype(jnp.bfloat16), lin_w_ref[...],
                     preferred_element_type=jnp.float32) + lin_b_ref[...]
    o_ref[...] = logits.reshape(o_ref.shape)


# ------------------------------ kernel wrapper --------------------------------

def _const_spec(shape):
    """Full-array block that is identical for every grid step (weights)."""
    nd = len(shape)
    return pl.BlockSpec(shape, lambda b, _nd=nd: (0,) * _nd)


def downsample_selection(h, w):
    """0/1 matrix selecting the (even-h, even-w) rows of a row-major (h*w, C) slab."""
    ho, wo = h // 2, w // 2
    sel = np.zeros((ho * wo, h * w), np.float32)
    r = np.arange(ho * wo)
    sel[r, (r // wo) * (2 * w) + (r % wo) * 2] = 1.0
    return jnp.asarray(sel, jnp.bfloat16)


def im2col_3x3(x):
    """3x3 / stride 1 / pad 1 patch extraction (layout plumbing for the stem)."""
    n, h, w, c = x.shape
    xp = jnp.pad(x, ((0, 0), (1, 1), (1, 1), (0, 0)))
    taps = [xp[:, dy:dy + h, dx:dx + w, :] for dy in range(3) for dx in range(3)]
    return jnp.concatenate(taps, axis=-1).reshape(n * h * w, 9 * c)


def search_share_stage_forward(params, x_nchw, weights_dag):
    x = jnp.transpose(x_nchw, (0, 2, 3, 1)).astype(jnp.float32)   # NCHW -> NHWC
    n, h, w, _ = x.shape
    hw = h * w

    # stem im2col; K stays at 36 (no HBM pad), bf16 since it feeds the MXU.
    x_col = im2col_3x3(x).astype(jnp.bfloat16)                    # (n*h*w, 36)

    # stride-2 row-selection matrices for the two reduction cells (constants).
    sel1 = downsample_selection(h, w)                             # (hw/4,  hw)
    sel2 = downsample_selection(h // 2, w // 2)                   # (hw/16, hw/4)

    p = params
    kern = functools.partial(fused_net_kernel,
                             n_nodes=N_BIG_NODES, window=WINDOW)
    out = pl.pallas_call(
        kern,
        out_shape=jax.ShapeDtypeStruct((n, 1, NC_PAD), jnp.float32),
        grid=(n,),                                                # one image / step
        in_specs=[
            pl.BlockSpec(memory_space=pltpu.MemorySpace.SMEM),    # DAG mix weights
            pl.BlockSpec((hw, K_IM2COL), lambda b: (b, 0)),       # per-image im2col slab
            _const_spec(p['stem_w'].shape),
            _const_spec(p['stem_scale'].shape),
            _const_spec(p['stem_shift'].shape),
            _const_spec(p['dag1']['w'].shape),
            _const_spec(p['dag1']['scale'].shape),
            _const_spec(p['dag1']['shift'].shape),
            _const_spec(sel1.shape),
            _const_spec(p['red1_w'].shape),
            _const_spec(p['red1_scale'].shape),
            _const_spec(p['red1_shift'].shape),
            _const_spec(p['dag2']['w'].shape),
            _const_spec(p['dag2']['scale'].shape),
            _const_spec(p['dag2']['shift'].shape),
            _const_spec(sel2.shape),
            _const_spec(p['red2_w'].shape),
            _const_spec(p['red2_scale'].shape),
            _const_spec(p['red2_shift'].shape),
            _const_spec(p['dag3']['w'].shape),
            _const_spec(p['dag3']['scale'].shape),
            _const_spec(p['dag3']['shift'].shape),
            _const_spec(p['lin_w'].shape),
            _const_spec(p['lin_b'].shape),
        ],
        out_specs=pl.BlockSpec((1, 1, NC_PAD), lambda b: (b, 0, 0)),
        compiler_params=pltpu.CompilerParams(
            dimension_semantics=("parallel",)),       # batch steps split across TCs (v7x)
    )(weights_dag, x_col,
      p['stem_w'], p['stem_scale'], p['stem_shift'],
      p['dag1']['w'], p['dag1']['scale'], p['dag1']['shift'],
      sel1, p['red1_w'], p['red1_scale'], p['red1_shift'],
      p['dag2']['w'], p['dag2']['scale'], p['dag2']['shift'],
      sel2, p['red2_w'], p['red2_scale'], p['red2_shift'],
      p['dag3']['w'], p['dag3']['scale'], p['dag3']['shift'],
      p['lin_w'], p['lin_b'])

    return out[:, 0, :N_CLASSES]                                  # (n, n_classes)


# --------------------------------- params -------------------------------------

def init_params(key):
    keys = jax.random.split(key, 7)

    def wmat(k, shape):
        return (0.1 * jax.random.normal(k, shape, jnp.float32)).astype(jnp.bfloat16)

    def bn(c):  # eval-mode BatchNorm folded to scale/shift (fresh init)
        return jnp.ones((1, c), jnp.float32), jnp.zeros((1, c), jnp.float32)

    def dag(k, c):
        subs = jax.random.split(k, N_BIG_NODES)
        return {
            'w': jnp.stack([wmat(sk, (c, c)) for sk in subs]),       # (NB, c, c) bf16
            'scale': jnp.ones((N_BIG_NODES, 1, c), jnp.float32),
            'shift': jnp.zeros((N_BIG_NODES, 1, c), jnp.float32),
        }

    p = {}
    # stem: 3x3 conv weights flattened (kh,kw,Cin)->Cout; K stays at 36.
    p['stem_w'] = wmat(keys[0], (K_IM2COL, C0))
    p['stem_scale'], p['stem_shift'] = bn(C0)
    p['dag1'] = dag(keys[1], C0)
    p['red1_w'] = wmat(keys[2], (C0, 2 * C0))
    p['red1_scale'], p['red1_shift'] = bn(2 * C0)
    p['dag2'] = dag(keys[3], 2 * C0)
    p['red2_w'] = wmat(keys[4], (2 * C0, 4 * C0))
    p['red2_scale'], p['red2_shift'] = bn(4 * C0)
    p['dag3'] = dag(keys[5], 4 * C0)
    # classifier: columns zero-padded 10 -> 128 for a lane-dense output slab.
    lin = 0.1 * jax.random.normal(keys[6], (4 * C0, N_CLASSES), jnp.float32)
    p['lin_w'] = jnp.pad(lin, ((0, 0), (0, NC_PAD - N_CLASSES))).astype(jnp.bfloat16)
    p['lin_b'] = jnp.zeros((1, NC_PAD), jnp.float32)
    return p


if __name__ == "__main__":
    key = jax.random.PRNGKey(0)
    kx, kw, kp = jax.random.split(key, 3)

    x = jax.random.normal(kx, (2, C_IN, 16, 16), jnp.float32)        # NCHW input
    alphas = jax.random.normal(kw, (N_BIG_NODES, WINDOW), jnp.float32)
    weights_dag = jax.nn.softmax(alphas, axis=-1)                    # relaxed arch weights

    params = init_params(kp)
    fwd = jax.jit(search_share_stage_forward)
    logits = fwd(params, x, weights_dag)
    logits = jax.block_until_ready(logits)

    assert logits.shape == (2, N_CLASSES)
    assert bool(jnp.all(jnp.isfinite(logits)))
    print("KERNEL_OK")
</pallas_src>

<mosaic_0001>
module attributes {stable_mosaic.version = 11 : i64} {
  func.func @fused_net_kernel(%arg0: i32, %arg1: memref<2x3xf32, #tpu.memory_space<smem>>, %arg2: memref<256x36xbf16, #tpu.memory_space<vmem>>, %arg3: memref<36x32xbf16, #tpu.memory_space<vmem>>, %arg4: memref<1x32xf32, #tpu.memory_space<vmem>>, %arg5: memref<1x32xf32, #tpu.memory_space<vmem>>, %arg6: memref<2x32x32xbf16, #tpu.memory_space<vmem>>, %arg7: memref<2x1x32xf32, #tpu.memory_space<vmem>>, %arg8: memref<2x1x32xf32, #tpu.memory_space<vmem>>, %arg9: memref<64x256xbf16, #tpu.memory_space<vmem>>, %arg10: memref<32x64xbf16, #tpu.memory_space<vmem>>, %arg11: memref<1x64xf32, #tpu.memory_space<vmem>>, %arg12: memref<1x64xf32, #tpu.memory_space<vmem>>, %arg13: memref<2x64x64xbf16, #tpu.memory_space<vmem>>, %arg14: memref<2x1x64xf32, #tpu.memory_space<vmem>>, %arg15: memref<2x1x64xf32, #tpu.memory_space<vmem>>, %arg16: memref<16x64xbf16, #tpu.memory_space<vmem>>, %arg17: memref<64x128xbf16, #tpu.memory_space<vmem>>, %arg18: memref<1x128xf32, #tpu.memory_space<vmem>>, %arg19: memref<1x128xf32, #tpu.memory_space<vmem>>, %arg20: memref<2x128x128xbf16, #tpu.memory_space<vmem>>, %arg21: memref<2x1x128xf32, #tpu.memory_space<vmem>>, %arg22: memref<2x1x128xf32, #tpu.memory_space<vmem>>, %arg23: memref<128x128xbf16, #tpu.memory_space<vmem>>, %arg24: memref<1x128xf32, #tpu.memory_space<vmem>>, %arg25: memref<1x1x128xf32, #tpu.memory_space<vmem>>) attributes {dimension_semantics = [#tpu.dimension_semantics<parallel>], iteration_bounds = array<i64: 2>, scalar_prefetch = 0 : i64, scratch_operands = 0 : i64, tpu.core_type = #tpu.core_type<tc>, window_params = [{transform_indices = @transform_0, window_bounds = array<i64: 2, 3>}, {transform_indices = @transform_1, window_bounds = array<i64: 256, 36>}, {pipeline_mode = #tpu.pipeline_mode<synchronous>, transform_indices = @transform_2, window_bounds = array<i64: 36, 32>}, {pipeline_mode = #tpu.pipeline_mode<synchronous>, transform_indices = @transform_3, window_bounds = array<i64: 1, 32>}, {pipeline_mode = #tpu.pipeline_mode<synchronous>, transform_indices = @transform_4, window_bounds = array<i64: 1, 32>}, {pipeline_mode = #tpu.pipeline_mode<synchronous>, transform_indices = @transform_5, window_bounds = array<i64: 2, 32, 32>}, {pipeline_mode = #tpu.pipeline_mode<synchronous>, transform_indices = @transform_6, window_bounds = array<i64: 2, 1, 32>}, {pipeline_mode = #tpu.pipeline_mode<synchronous>, transform_indices = @transform_7, window_bounds = array<i64: 2, 1, 32>}, {pipeline_mode = #tpu.pipeline_mode<synchronous>, transform_indices = @transform_8, window_bounds = array<i64: 64, 256>}, {pipeline_mode = #tpu.pipeline_mode<synchronous>, transform_indices = @transform_9, window_bounds = array<i64: 32, 64>}, {pipeline_mode = #tpu.pipeline_mode<synchronous>, transform_indices = @transform_10, window_bounds = array<i64: 1, 64>}, {pipeline_mode = #tpu.pipeline_mode<synchronous>, transform_indices = @transform_11, window_bounds = array<i64: 1, 64>}, {pipeline_mode = #tpu.pipeline_mode<synchronous>, transform_indices = @transform_12, window_bounds = array<i64: 2, 64, 64>}, {pipeline_mode = #tpu.pipeline_mode<synchronous>, transform_indices = @transform_13, window_bounds = array<i64: 2, 1, 64>}, {pipeline_mode = #tpu.pipeline_mode<synchronous>, transform_indices = @transform_14, window_bounds = array<i64: 2, 1, 64>}, {pipeline_mode = #tpu.pipeline_mode<synchronous>, transform_indices = @transform_15, window_bounds = array<i64: 16, 64>}, {pipeline_mode = #tpu.pipeline_mode<synchronous>, transform_indices = @transform_16, window_bounds = array<i64: 64, 128>}, {pipeline_mode = #tpu.pipeline_mode<synchronous>, transform_indices = @transform_17, window_bounds = array<i64: 1, 128>}, {pipeline_mode = #tpu.pipeline_mode<synchronous>, transform_indices = @transform_18, window_bounds = array<i64: 1, 128>}, {pipeline_mode = #tpu.pipeline_mode<synchronous>, transform_indices = @transform_19, window_bounds = array<i64: 2, 128, 128>}, {pipeline_mode = #tpu.pipeline_mode<synchronous>, transform_indices = @transform_20, window_bounds = array<i64: 2, 1, 128>}, {pipeline_mode = #tpu.pipeline_mode<synchronous>, transform_indices = @transform_21, window_bounds = array<i64: 2, 1, 128>}, {pipeline_mode = #tpu.pipeline_mode<synchronous>, transform_indices = @transform_22, window_bounds = array<i64: 128, 128>}, {pipeline_mode = #tpu.pipeline_mode<synchronous>, transform_indices = @transform_23, window_bounds = array<i64: 1, 128>}, {transform_indices = @transform_24, window_bounds = array<i64: 1, 1, 128>}]} {
    %c0 = arith.constant 0 : index
    %c0_0 = arith.constant 0 : index
    %0 = memref.load %arg1[%c0, %c0_0] : memref<2x3xf32, #tpu.memory_space<smem>>
    %c0_1 = arith.constant 0 : index
    %c1 = arith.constant 1 : index
    %1 = memref.load %arg1[%c0_1, %c1] : memref<2x3xf32, #tpu.memory_space<smem>>
    %c1_2 = arith.constant 1 : index
    %c0_3 = arith.constant 0 : index
    %2 = memref.load %arg1[%c1_2, %c0_3] : memref<2x3xf32, #tpu.memory_space<smem>>
    %c1_4 = arith.constant 1 : index
    %c1_5 = arith.constant 1 : index
    %3 = memref.load %arg1[%c1_4, %c1_5] : memref<2x3xf32, #tpu.memory_space<smem>>
    %c1_6 = arith.constant 1 : index
    %c2 = arith.constant 2 : index
    %4 = memref.load %arg1[%c1_6, %c2] : memref<2x3xf32, #tpu.memory_space<smem>>
    %c0_7 = arith.constant 0 : index
    %c0_8 = arith.constant 0 : index
    %5 = vector.load %arg2[%c0_7, %c0_8] : memref<256x36xbf16, #tpu.memory_space<vmem>>, vector<256x36xbf16>
    %c0_9 = arith.constant 0 : index
    %c0_10 = arith.constant 0 : index
    %6 = vector.load %arg3[%c0_9, %c0_10] : memref<36x32xbf16, #tpu.memory_space<vmem>>, vector<36x32xbf16>
    %cst = arith.constant dense<0.000000e+00> : vector<256x32xf32>
    %7 = tpu.matmul %5, %6, %cst {dimension_numbers = #tpu.dot_dimension_numbers<[1], [0], [0], [1], [0, 0, 1, 1], [], []>} : vector<256x36xbf16>, vector<36x32xbf16>, vector<256x32xf32> -> vector<256x32xf32>
    %c0_11 = arith.constant 0 : index
    %c0_12 = arith.constant 0 : index
    %8 = vector.load %arg4[%c0_11, %c0_12] : memref<1x32xf32, #tpu.memory_space<vmem>>, vector<1x32xf32>
    %9 = vector.broadcast %8 : vector<1x32xf32> to vector<256x32xf32>
    %10 = arith.mulf %7, %9 : vector<256x32xf32>
    %c0_13 = arith.constant 0 : index
    %c0_14 = arith.constant 0 : index
    %11 = vector.load %arg5[%c0_13, %c0_14] : memref<1x32xf32, #tpu.memory_space<vmem>>, vector<1x32xf32>
    %12 = vector.broadcast %11 : vector<1x32xf32> to vector<256x32xf32>
    %13 = arith.addf %10, %12 : vector<256x32xf32>
    %14 = vector.broadcast %0 : f32 to vector<256x32xf32>
    %15 = arith.mulf %13, %14 : vector<256x32xf32>
    %16 = vector.broadcast %1 : f32 to vector<256x32xf32>
    %17 = arith.mulf %13, %16 : vector<256x32xf32>
    %18 = arith.addf %15, %17 : vector<256x32xf32>
    %cst_15 = arith.constant 0.000000e+00 : f32
    %19 = vector.broadcast %cst_15 : f32 to vector<256x32xf32>
    %20 = arith.maximumf %18, %19 : vector<256x32xf32>
    %21 = arith.truncf %20 : vector<256x32xf32> to vector<256x32xbf16>
    %c0_16 = arith.constant 0 : index
    %c0_17 = arith.constant 0 : index
    %c0_18 = arith.constant 0 : index
    %22 = vector.load %arg6[%c0_16, %c0_17, %c0_18] : memref<2x32x32xbf16, #tpu.memory_space<vmem>>, vector<1x32x32xbf16>
    %23 = vector.shape_cast %22 : vector<1x32x32xbf16> to vector<32x32xbf16>
    %cst_19 = arith.constant dense<0.000000e+00> : vector<256x32xf32>
    %24 = tpu.matmul %21, %23, %cst_19 {dimension_numbers = #tpu.dot_dimension_numbers<[1], [0], [0], [1], [0, 0, 1, 1], [], []>} : vector<256x32xbf16>, vector<32x32xbf16>, vector<256x32xf32> -> vector<256x32xf32>
    %c0_20 = arith.constant 0 : index
    %c0_21 = arith.constant 0 : index
    %c0_22 = arith.constant 0 : index
    %25 = vector.load %arg7[%c0_20, %c0_21, %c0_22] : memref<2x1x32xf32, #tpu.memory_space<vmem>>, vector<1x1x32xf32>
    %26 = vector.shape_cast %25 : vector<1x1x32xf32> to vector<1x32xf32>
    %27 = vector.broadcast %26 : vector<1x32xf32> to vector<256x32xf32>
    %28 = arith.mulf %24, %27 : vector<256x32xf32>
    %c0_23 = arith.constant 0 : index
    %c0_24 = arith.constant 0 : index
    %c0_25 = arith.constant 0 : index
    %29 = vector.load %arg8[%c0_23, %c0_24, %c0_25] : memref<2x1x32xf32, #tpu.memory_space<vmem>>, vector<1x1x32xf32>
    %30 = vector.shape_cast %29 : vector<1x1x32xf32> to vector<1x32xf32>
    %31 = vector.broadcast %30 : vector<1x32xf32> to vector<256x32xf32>
    %32 = arith.addf %28, %31 : vector<256x32xf32>
    %33 = vector.broadcast %2 : f32 to vector<256x32xf32>
    %34 = arith.mulf %13, %33 : vector<256x32xf32>
    %35 = vector.broadcast %3 : f32 to vector<256x32xf32>
    %36 = arith.mulf %13, %35 : vector<256x32xf32>
    %37 = arith.addf %34, %36 : vector<256x32xf32>
    %38 = vector.broadcast %4 : f32 to vector<256x32xf32>
    %39 = arith.mulf %32, %38 : vector<256x32xf32>
    %40 = arith.addf %37, %39 : vector<256x32xf32>
    %cst_26 = arith.constant 0.000000e+00 : f32
    %41 = vector.broadcast %cst_26 : f32 to vector<256x32xf32>
    %42 = arith.maximumf %40, %41 : vector<256x32xf32>
    %43 = arith.truncf %42 : vector<256x32xf32> to vector<256x32xbf16>
    %c1_27 = arith.constant 1 : index
    %c0_28 = arith.constant 0 : index
    %c0_29 = arith.constant 0 : index
    %44 = vector.load %arg6[%c1_27, %c0_28, %c0_29] : memref<2x32x32xbf16, #tpu.memory_space<vmem>>, vector<1x32x32xbf16>
    %45 = vector.shape_cast %44 : vector<1x32x32xbf16> to vector<32x32xbf16>
    %cst_30 = arith.constant dense<0.000000e+00> : vector<256x32xf32>
    %46 = tpu.matmul %43, %45, %cst_30 {dimension_numbers = #tpu.dot_dimension_numbers<[1], [0], [0], [1], [0, 0, 1, 1], [], []>} : vector<256x32xbf16>, vector<32x32xbf16>, vector<256x32xf32> -> vector<256x32xf32>
    %c1_31 = arith.constant 1 : index
    %c0_32 = arith.constant 0 : index
    %c0_33 = arith.constant 0 : index
    %47 = vector.load %arg7[%c1_31, %c0_32, %c0_33] : memref<2x1x32xf32, #tpu.memory_space<vmem>>, vector<1x1x32xf32>
    %48 = vector.shape_cast %47 : vector<1x1x32xf32> to vector<1x32xf32>
    %49 = vector.broadcast %48 : vector<1x32xf32> to vector<256x32xf32>
    %50 = arith.mulf %46, %49 : vector<256x32xf32>
    %c1_34 = arith.constant 1 : index
    %c0_35 = arith.constant 0 : index
    %c0_36 = arith.constant 0 : index
    %51 = vector.load %arg8[%c1_34, %c0_35, %c0_36] : memref<2x1x32xf32, #tpu.memory_space<vmem>>, vector<1x1x32xf32>
    %52 = vector.shape_cast %51 : vector<1x1x32xf32> to vector<1x32xf32>
    %53 = vector.broadcast %52 : vector<1x32xf32> to vector<256x32xf32>
    %54 = arith.addf %50, %53 : vector<256x32xf32>
    %c0_37 = arith.constant 0 : index
    %c0_38 = arith.constant 0 : index
    %55 = vector.load %arg9[%c0_37, %c0_38] : memref<64x256xbf16, #tpu.memory_space<vmem>>, vector<64x256xbf16>
    %56 = arith.truncf %54 : vector<256x32xf32> to vector<256x32xbf16>
    %cst_39 = arith.constant dense<0.000000e+00> : vector<64x32xf32>
    %57 = tpu.matmul %55, %56, %cst_39 {dimension_numbers = #tpu.dot_dimension_numbers<[1], [0], [0], [1], [0, 0, 1, 1], [], []>} : vector<64x256xbf16>, vector<256x32xbf16>, vector<64x32xf32> -> vector<64x32xf32>
    %cst_40 = arith.constant 0.000000e+00 : f32
    %58 = vector.broadcast %cst_40 : f32 to vector<64x32xf32>
    %59 = arith.maximumf %57, %58 : vector<64x32xf32>
    %60 = arith.truncf %59 : vector<64x32xf32> to vector<64x32xbf16>
    %c0_41 = arith.constant 0 : index
    %c0_42 = arith.constant 0 : index
    %61 = vector.load %arg10[%c0_41, %c0_42] : memref<32x64xbf16, #tpu.memory_space<vmem>>, vector<32x64xbf16>
    %cst_43 = arith.constant dense<0.000000e+00> : vector<64x64xf32>
    %62 = tpu.matmul %60, %61, %cst_43 {dimension_numbers = #tpu.dot_dimension_numbers<[1], [0], [0], [1], [0, 0, 1, 1], [], []>} : vector<64x32xbf16>, vector<32x64xbf16>, vector<64x64xf32> -> vector<64x64xf32>
    %c0_44 = arith.constant 0 : index
    %c0_45 = arith.constant 0 : index
    %63 = vector.load %arg11[%c0_44, %c0_45] : memref<1x64xf32, #tpu.memory_space<vmem>>, vector<1x64xf32>
    %64 = vector.broadcast %63 : vector<1x64xf32> to vector<64x64xf32>
    %65 = arith.mulf %62, %64 : vector<64x64xf32>
    %c0_46 = arith.constant 0 : index
    %c0_47 = arith.constant 0 : index
    %66 = vector.load %arg12[%c0_46, %c0_47] : memref<1x64xf32, #tpu.memory_space<vmem>>, vector<1x64xf32>
    %67 = vector.broadcast %66 : vector<1x64xf32> to vector<64x64xf32>
    %68 = arith.addf %65, %67 : vector<64x64xf32>
    %69 = vector.broadcast %0 : f32 to vector<64x64xf32>
    %70 = arith.mulf %68, %69 : vector<64x64xf32>
    %71 = vector.broadcast %1 : f32 to vector<64x64xf32>
    %72 = arith.mulf %68, %71 : vector<64x64xf32>
    %73 = arith.addf %70, %72 : vector<64x64xf32>
    %cst_48 = arith.constant 0.000000e+00 : f32
    %74 = vector.broadcast %cst_48 : f32 to vector<64x64xf32>
    %75 = arith.maximumf %73, %74 : vector<64x64xf32>
    %76 = arith.truncf %75 : vector<64x64xf32> to vector<64x64xbf16>
    %c0_49 = arith.constant 0 : index
    %c0_50 = arith.constant 0 : index
    %c0_51 = arith.constant 0 : index
    %77 = vector.load %arg13[%c0_49, %c0_50, %c0_51] : memref<2x64x64xbf16, #tpu.memory_space<vmem>>, vector<1x64x64xbf16>
    %78 = vector.shape_cast %77 : vector<1x64x64xbf16> to vector<64x64xbf16>
    %cst_52 = arith.constant dense<0.000000e+00> : vector<64x64xf32>
    %79 = tpu.matmul %76, %78, %cst_52 {dimension_numbers = #tpu.dot_dimension_numbers<[1], [0], [0], [1], [0, 0, 1, 1], [], []>} : vector<64x64xbf16>, vector<64x64xbf16>, vector<64x64xf32> -> vector<64x64xf32>
    %c0_53 = arith.constant 0 : index
    %c0_54 = arith.constant 0 : index
    %c0_55 = arith.constant 0 : index
    %80 = vector.load %arg14[%c0_53, %c0_54, %c0_55] : memref<2x1x64xf32, #tpu.memory_space<vmem>>, vector<1x1x64xf32>
    %81 = vector.shape_cast %80 : vector<1x1x64xf32> to vector<1x64xf32>
    %82 = vector.broadcast %81 : vector<1x64xf32> to vector<64x64xf32>
    %83 = arith.mulf %79, %82 : vector<64x64xf32>
    %c0_56 = arith.constant 0 : index
    %c0_57 = arith.constant 0 : index
    %c0_58 = arith.constant 0 : index
    %84 = vector.load %arg15[%c0_56, %c0_57, %c0_58] : memref<2x1x64xf32, #tpu.memory_space<vmem>>, vector<1x1x64xf32>
    %85 = vector.shape_cast %84 : vector<1x1x64xf32> to vector<1x64xf32>
    %86 = vector.broadcast %85 : vector<1x64xf32> to vector<64x64xf32>
    %87 = arith.addf %83, %86 : vector<64x64xf32>
    %88 = vector.broadcast %2 : f32 to vector<64x64xf32>
    %89 = arith.mulf %68, %88 : vector<64x64xf32>
    %90 = vector.broadcast %3 : f32 to vector<64x64xf32>
    %91 = arith.mulf %68, %90 : vector<64x64xf32>
    %92 = arith.addf %89, %91 : vector<64x64xf32>
    %93 = vector.broadcast %4 : f32 to vector<64x64xf32>
    %94 = arith.mulf %87, %93 : vector<64x64xf32>
    %95 = arith.addf %92, %94 : vector<64x64xf32>
    %cst_59 = arith.constant 0.000000e+00 : f32
    %96 = vector.broadcast %cst_59 : f32 to vector<64x64xf32>
    %97 = arith.maximumf %95, %96 : vector<64x64xf32>
    %98 = arith.truncf %97 : vector<64x64xf32> to vector<64x64xbf16>
    %c1_60 = arith.constant 1 : index
    %c0_61 = arith.constant 0 : index
    %c0_62 = arith.constant 0 : index
    %99 = vector.load %arg13[%c1_60, %c0_61, %c0_62] : memref<2x64x64xbf16, #tpu.memory_space<vmem>>, vector<1x64x64xbf16>
    %100 = vector.shape_cast %99 : vector<1x64x64xbf16> to vector<64x64xbf16>
    %cst_63 = arith.constant dense<0.000000e+00> : vector<64x64xf32>
    %101 = tpu.matmul %98, %100, %cst_63 {dimension_numbers = #tpu.dot_dimension_numbers<[1], [0], [0], [1], [0, 0, 1, 1], [], []>} : vector<64x64xbf16>, vector<64x64xbf16>, vector<64x64xf32> -> vector<64x64xf32>
    %c1_64 = arith.constant 1 : index
    %c0_65 = arith.constant 0 : index
    %c0_66 = arith.constant 0 : index
    %102 = vector.load %arg14[%c1_64, %c0_65, %c0_66] : memref<2x1x64xf32, #tpu.memory_space<vmem>>, vector<1x1x64xf32>
    %103 = vector.shape_cast %102 : vector<1x1x64xf32> to vector<1x64xf32>
    %104 = vector.broadcast %103 : vector<1x64xf32> to vector<64x64xf32>
    %105 = arith.mulf %101, %104 : vector<64x64xf32>
    %c1_67 = arith.constant 1 : index
    %c0_68 = arith.constant 0 : index
    %c0_69 = arith.constant 0 : index
    %106 = vector.load %arg15[%c1_67, %c0_68, %c0_69] : memref<2x1x64xf32, #tpu.memory_space<vmem>>, vector<1x1x64xf32>
    %107 = vector.shape_cast %106 : vector<1x1x64xf32> to vector<1x64xf32>
    %108 = vector.broadcast %107 : vector<1x64xf32> to vector<64x64xf32>
    %109 = arith.addf %105, %108 : vector<64x64xf32>
    %c0_70 = arith.constant 0 : index
    %c0_71 = arith.constant 0 : index
    %110 = vector.load %arg16[%c0_70, %c0_71] : memref<16x64xbf16, #tpu.memory_space<vmem>>, vector<16x64xbf16>
    %111 = arith.truncf %109 : vector<64x64xf32> to vector<64x64xbf16>
    %cst_72 = arith.constant dense<0.000000e+00> : vector<16x64xf32>
    %112 = tpu.matmul %110, %111, %cst_72 {dimension_numbers = #tpu.dot_dimension_numbers<[1], [0], [0], [1], [0, 0, 1, 1], [], []>} : vector<16x64xbf16>, vector<64x64xbf16>, vector<16x64xf32> -> vector<16x64xf32>
    %cst_73 = arith.constant 0.000000e+00 : f32
    %113 = vector.broadcast %cst_73 : f32 to vector<16x64xf32>
    %114 = arith.maximumf %112, %113 : vector<16x64xf32>
    %115 = arith.truncf %114 : vector<16x64xf32> to vector<16x64xbf16>
    %c0_74 = arith.constant 0 : index
    %c0_75 = arith.constant 0 : index
    %116 = vector.load %arg17[%c0_74, %c0_75] : memref<64x128xbf16, #tpu.memory_space<vmem>>, vector<64x128xbf16>
    %cst_76 = arith.constant dense<0.000000e+00> : vector<16x128xf32>
    %117 = tpu.matmul %115, %116, %cst_76 {dimension_numbers = #tpu.dot_dimension_numbers<[1], [0], [0], [1], [0, 0, 1, 1], [], []>} : vector<16x64xbf16>, vector<64x128xbf16>, vector<16x128xf32> -> vector<16x128xf32>
    %c0_77 = arith.constant 0 : index
    %c0_78 = arith.constant 0 : index
    %118 = vector.load %arg18[%c0_77, %c0_78] : memref<1x128xf32, #tpu.memory_space<vmem>>, vector<1x128xf32>
    %119 = vector.broadcast %118 : vector<1x128xf32> to vector<16x128xf32>
    %120 = arith.mulf %117, %119 : vector<16x128xf32>
    %c0_79 = arith.constant 0 : index
    %c0_80 = arith.constant 0 : index
    %121 = vector.load %arg19[%c0_79, %c0_80] : memref<1x128xf32, #tpu.memory_space<vmem>>, vector<1x128xf32>
    %122 = vector.broadcast %121 : vector<1x128xf32> to vector<16x128xf32>
    %123 = arith.addf %120, %122 : vector<16x128xf32>
    %124 = vector.broadcast %0 : f32 to vector<16x128xf32>
    %125 = arith.mulf %123, %124 : vector<16x128xf32>
    %126 = vector.broadcast %1 : f32 to vector<16x128xf32>
    %127 = arith.mulf %123, %126 : vector<16x128xf32>
    %128 = arith.addf %125, %127 : vector<16x128xf32>
    %cst_81 = arith.constant 0.000000e+00 : f32
    %129 = vector.broadcast %cst_81 : f32 to vector<16x128xf32>
    %130 = arith.maximumf %128, %129 : vector<16x128xf32>
    %131 = arith.truncf %130 : vector<16x128xf32> to vector<16x128xbf16>
    %c0_82 = arith.constant 0 : index
    %c0_83 = arith.constant 0 : index
    %c0_84 = arith.constant 0 : index
    %132 = vector.load %arg20[%c0_82, %c0_83, %c0_84] : memref<2x128x128xbf16, #tpu.memory_space<vmem>>, vector<1x128x128xbf16>
    %133 = vector.shape_cast %132 : vector<1x128x128xbf16> to vector<128x128xbf16>
    %cst_85 = arith.constant dense<0.000000e+00> : vector<16x128xf32>
    %134 = tpu.matmul %131, %133, %cst_85 {dimension_numbers = #tpu.dot_dimension_numbers<[1], [0], [0], [1], [0, 0, 1, 1], [], []>} : vector<16x128xbf16>, vector<128x128xbf16>, vector<16x128xf32> -> vector<16x128xf32>
    %c0_86 = arith.constant 0 : index
    %c0_87 = arith.constant 0 : index
    %c0_88 = arith.constant 0 : index
    %135 = vector.load %arg21[%c0_86, %c0_87, %c0_88] : memref<2x1x128xf32, #tpu.memory_space<vmem>>, vector<1x1x128xf32>
    %136 = vector.shape_cast %135 : vector<1x1x128xf32> to vector<1x128xf32>
    %137 = vector.broadcast %136 : vector<1x128xf32> to vector<16x128xf32>
    %138 = arith.mulf %134, %137 : vector<16x128xf32>
    %c0_89 = arith.constant 0 : index
    %c0_90 = arith.constant 0 : index
    %c0_91 = arith.constant 0 : index
    %139 = vector.load %arg22[%c0_89, %c0_90, %c0_91] : memref<2x1x128xf32, #tpu.memory_space<vmem>>, vector<1x1x128xf32>
    %140 = vector.shape_cast %139 : vector<1x1x128xf32> to vector<1x128xf32>
    %141 = vector.broadcast %140 : vector<1x128xf32> to vector<16x128xf32>
    %142 = arith.addf %138, %141 : vector<16x128xf32>
    %143 = vector.broadcast %2 : f32 to vector<16x128xf32>
    %144 = arith.mulf %123, %143 : vector<16x128xf32>
    %145 = vector.broadcast %3 : f32 to vector<16x128xf32>
    %146 = arith.mulf %123, %145 : vector<16x128xf32>
    %147 = arith.addf %144, %146 : vector<16x128xf32>
    %148 = vector.broadcast %4 : f32 to vector<16x128xf32>
    %149 = arith.mulf %142, %148 : vector<16x128xf32>
    %150 = arith.addf %147, %149 : vector<16x128xf32>
    %cst_92 = arith.constant 0.000000e+00 : f32
    %151 = vector.broadcast %cst_92 : f32 to vector<16x128xf32>
    %152 = arith.maximumf %150, %151 : vector<16x128xf32>
    %153 = arith.truncf %152 : vector<16x128xf32> to vector<16x128xbf16>
    %c1_93 = arith.constant 1 : index
    %c0_94 = arith.constant 0 : index
    %c0_95 = arith.constant 0 : index
    %154 = vector.load %arg20[%c1_93, %c0_94, %c0_95] : memref<2x128x128xbf16, #tpu.memory_space<vmem>>, vector<1x128x128xbf16>
    %155 = vector.shape_cast %154 : vector<1x128x128xbf16> to vector<128x128xbf16>
    %cst_96 = arith.constant dense<0.000000e+00> : vector<16x128xf32>
    %156 = tpu.matmul %153, %155, %cst_96 {dimension_numbers = #tpu.dot_dimension_numbers<[1], [0], [0], [1], [0, 0, 1, 1], [], []>} : vector<16x128xbf16>, vector<128x128xbf16>, vector<16x128xf32> -> vector<16x128xf32>
    %c1_97 = arith.constant 1 : index
    %c0_98 = arith.constant 0 : index
    %c0_99 = arith.constant 0 : index
    %157 = vector.load %arg21[%c1_97, %c0_98, %c0_99] : memref<2x1x128xf32, #tpu.memory_space<vmem>>, vector<1x1x128xf32>
    %158 = vector.shape_cast %157 : vector<1x1x128xf32> to vector<1x128xf32>
    %159 = vector.broadcast %158 : vector<1x128xf32> to vector<16x128xf32>
    %160 = arith.mulf %156, %159 : vector<16x128xf32>
    %c1_100 = arith.constant 1 : index
    %c0_101 = arith.constant 0 : index
    %c0_102 = arith.constant 0 : index
    %161 = vector.load %arg22[%c1_100, %c0_101, %c0_102] : memref<2x1x128xf32, #tpu.memory_space<vmem>>, vector<1x1x128xf32>
    %162 = vector.shape_cast %161 : vector<1x1x128xf32> to vector<1x128xf32>
    %163 = vector.broadcast %162 : vector<1x128xf32> to vector<16x128xf32>
    %164 = arith.addf %160, %163 : vector<16x128xf32>
    %cst_103 = arith.constant dense<0.000000e+00> : vector<128xf32>
    %165 = vector.multi_reduction <add>, %164, %cst_103 [0] : vector<16x128xf32> to vector<128xf32>
    %166 = vector.shape_cast %165 : vector<128xf32> to vector<1x128xf32>
    %cst_104 = arith.constant 6.250000e-02 : f32
    %167 = vector.broadcast %cst_104 : f32 to vector<1x128xf32>
    %168 = arith.mulf %166, %167 : vector<1x128xf32>
    %169 = arith.truncf %168 : vector<1x128xf32> to vector<1x128xbf16>
    %c0_105 = arith.constant 0 : index
    %c0_106 = arith.constant 0 : index
    %170 = vector.load %arg23[%c0_105, %c0_106] : memref<128x128xbf16, #tpu.memory_space<vmem>>, vector<128x128xbf16>
    %cst_107 = arith.constant dense<0.000000e+00> : vector<1x128xf32>
    %171 = tpu.matmul %169, %170, %cst_107 {dimension_numbers = #tpu.dot_dimension_numbers<[1], [0], [0], [1], [0, 0, 1, 1], [], []>} : vector<1x128xbf16>, vector<128x128xbf16>, vector<1x128xf32> -> vector<1x128xf32>
    %c0_108 = arith.constant 0 : index
    %c0_109 = arith.constant 0 : index
    %172 = vector.load %arg24[%c0_108, %c0_109] : memref<1x128xf32, #tpu.memory_space<vmem>>, vector<1x128xf32>
    %173 = arith.addf %171, %172 : vector<1x128xf32>
    %174 = vector.shape_cast %173 : vector<1x128xf32> to vector<1x1x128xf32>
    %c0_110 = arith.constant 0 : index
    %c0_111 = arith.constant 0 : index
    %c0_112 = arith.constant 0 : index
    %175 = vector.load %arg25[%c0_110, %c0_111, %c0_112] : memref<1x1x128xf32, #tpu.memory_space<vmem>>, vector<1x1x128xf32>
    tpu.vector_store %arg25[%c0_110, %c0_111, %c0_112], %174 {strides = array<i32>} : memref<1x1x128xf32, #tpu.memory_space<vmem>>, vector<1x1x128xf32>,
    return
  }
  func.func @transform_0(%arg0: i32) -> (i32, i32) {
    %c0_i32 = arith.constant 0 : i32
    %c0_i32_0 = arith.constant 0 : i32
    %c0_i32_1 = arith.constant 0 : i32
    return %c0_i32, %c0_i32_0 : i32, i32
  }
  func.func @transform_1(%arg0: i32) -> (i32, i32) {
    %c0_i32 = arith.constant 0 : i32
    %c0_i32_0 = arith.constant 0 : i32
    return %arg0, %c0_i32 : i32, i32
  }
  func.func @transform_2(%arg0: i32) -> (i32, i32) {
    %c0_i32 = arith.constant 0 : i32
    %c0_i32_0 = arith.constant 0 : i32
    %c0_i32_1 = arith.constant 0 : i32
    return %c0_i32, %c0_i32_0 : i32, i32
  }
  func.func @transform_3(%arg0: i32) -> (i32, i32) {
    %c0_i32 = arith.constant 0 : i32
    %c0_i32_0 = arith.constant 0 : i32
    %c0_i32_1 = arith.constant 0 : i32
    return %c0_i32, %c0_i32_0 : i32, i32
  }
  func.func @transform_4(%arg0: i32) -> (i32, i32) {
    %c0_i32 = arith.constant 0 : i32
    %c0_i32_0 = arith.constant 0 : i32
    %c0_i32_1 = arith.constant 0 : i32
    return %c0_i32, %c0_i32_0 : i32, i32
  }
  func.func @transform_5(%arg0: i32) -> (i32, i32, i32) {
    %c0_i32 = arith.constant 0 : i32
    %c0_i32_0 = arith.constant 0 : i32
    %c0_i32_1 = arith.constant 0 : i32
    %c0_i32_2 = arith.constant 0 : i32
    return %c0_i32, %c0_i32_0, %c0_i32_1 : i32, i32, i32
  }
  func.func @transform_6(%arg0: i32) -> (i32, i32, i32) {
    %c0_i32 = arith.constant 0 : i32
    %c0_i32_0 = arith.constant 0 : i32
    %c0_i32_1 = arith.constant 0 : i32
    %c0_i32_2 = arith.constant 0 : i32
    return %c0_i32, %c0_i32_0, %c0_i32_1 : i32, i32, i32
  }
  func.func @transform_7(%arg0: i32) -> (i32, i32, i32) {
    %c0_i32 = arith.constant 0 : i32
    %c0_i32_0 = arith.constant 0 : i32
    %c0_i32_1 = arith.constant 0 : i32
    %c0_i32_2 = arith.constant 0 : i32
    return %c0_i32, %c0_i32_0, %c0_i32_1 : i32, i32, i32
  }
  func.func @transform_8(%arg0: i32) -> (i32, i32) {
    %c0_i32 = arith.constant 0 : i32
    %c0_i32_0 = arith.constant 0 : i32
    %c0_i32_1 = arith.constant 0 : i32
    return %c0_i32, %c0_i32_0 : i32, i32
  }
  func.func @transform_9(%arg0: i32) -> (i32, i32) {
    %c0_i32 = arith.constant 0 : i32
    %c0_i32_0 = arith.constant 0 : i32
    %c0_i32_1 = arith.constant 0 : i32
    return %c0_i32, %c0_i32_0 : i32, i32
  }
  func.func @transform_10(%arg0: i32) -> (i32, i32) {
    %c0_i32 = arith.constant 0 : i32
    %c0_i32_0 = arith.constant 0 : i32
    %c0_i32_1 = arith.constant 0 : i32
    return %c0_i32, %c0_i32_0 : i32, i32
  }
  func.func @transform_11(%arg0: i32) -> (i32, i32) {
    %c0_i32 = arith.constant 0 : i32
    %c0_i32_0 = arith.constant 0 : i32
    %c0_i32_1 = arith.constant 0 : i32
    return %c0_i32, %c0_i32_0 : i32, i32
  }
  func.func @transform_12(%arg0: i32) -> (i32, i32, i32) {
    %c0_i32 = arith.constant 0 : i32
    %c0_i32_0 = arith.constant 0 : i32
    %c0_i32_1 = arith.constant 0 : i32
    %c0_i32_2 = arith.constant 0 : i32
    return %c0_i32, %c0_i32_0, %c0_i32_1 : i32, i32, i32
  }
  func.func @transform_13(%arg0: i32) -> (i32, i32, i32) {
    %c0_i32 = arith.constant 0 : i32
    %c0_i32_0 = arith.constant 0 : i32
    %c0_i32_1 = arith.constant 0 : i32
    %c0_i32_2 = arith.constant 0 : i32
    return %c0_i32, %c0_i32_0, %c0_i32_1 : i32, i32, i32
  }
  func.func @transform_14(%arg0: i32) -> (i32, i32, i32) {
    %c0_i32 = arith.constant 0 : i32
    %c0_i32_0 = arith.constant 0 : i32
    %c0_i32_1 = arith.constant 0 : i32
    %c0_i32_2 = arith.constant 0 : i32
    return %c0_i32, %c0_i32_0, %c0_i32_1 : i32, i32, i32
  }
  func.func @transform_15(%arg0: i32) -> (i32, i32) {
    %c0_i32 = arith.constant 0 : i32
    %c0_i32_0 = arith.constant 0 : i32
    %c0_i32_1 = arith.constant 0 : i32
    return %c0_i32, %c0_i32_0 : i32, i32
  }
  func.func @transform_16(%arg0: i32) -> (i32, i32) {
    %c0_i32 = arith.constant 0 : i32
    %c0_i32_0 = arith.constant 0 : i32
    %c0_i32_1 = arith.constant 0 : i32
    return %c0_i32, %c0_i32_0 : i32, i32
  }
  func.func @transform_17(%arg0: i32) -> (i32, i32) {
    %c0_i32 = arith.constant 0 : i32
    %c0_i32_0 = arith.constant 0 : i32
    %c0_i32_1 = arith.constant 0 : i32
    return %c0_i32, %c0_i32_0 : i32, i32
  }
  func.func @transform_18(%arg0: i32) -> (i32, i32) {
    %c0_i32 = arith.constant 0 : i32
    %c0_i32_0 = arith.constant 0 : i32
    %c0_i32_1 = arith.constant 0 : i32
    return %c0_i32, %c0_i32_0 : i32, i32
  }
  func.func @transform_19(%arg0: i32) -> (i32, i32, i32) {
    %c0_i32 = arith.constant 0 : i32
    %c0_i32_0 = arith.constant 0 : i32
    %c0_i32_1 = arith.constant 0 : i32
    %c0_i32_2 = arith.constant 0 : i32
    return %c0_i32, %c0_i32_0, %c0_i32_1 : i32, i32, i32
  }
  func.func @transform_20(%arg0: i32) -> (i32, i32, i32) {
    %c0_i32 = arith.constant 0 : i32
    %c0_i32_0 = arith.constant 0 : i32
    %c0_i32_1 = arith.constant 0 : i32
    %c0_i32_2 = arith.constant 0 : i32
    return %c0_i32, %c0_i32_0, %c0_i32_1 : i32, i32, i32
  }
  func.func @transform_21(%arg0: i32) -> (i32, i32, i32) {
    %c0_i32 = arith.constant 0 : i32
    %c0_i32_0 = arith.constant 0 : i32
    %c0_i32_1 = arith.constant 0 : i32
    %c0_i32_2 = arith.constant 0 : i32
    return %c0_i32, %c0_i32_0, %c0_i32_1 : i32, i32, i32
  }
  func.func @transform_22(%arg0: i32) -> (i32, i32) {
    %c0_i32 = arith.constant 0 : i32
    %c0_i32_0 = arith.constant 0 : i32
    %c0_i32_1 = arith.constant 0 : i32
    return %c0_i32, %c0_i32_0 : i32, i32
  }
  func.func @transform_23(%arg0: i32) -> (i32, i32) {
    %c0_i32 = arith.constant 0 : i32
    %c0_i32_0 = arith.constant 0 : i32
    %c0_i32_1 = arith.constant 0 : i32
    return %c0_i32, %c0_i32_0 : i32, i32
  }
  func.func @transform_24(%arg0: i32) -> (i32, i32, i32) {
    %c0_i32 = arith.constant 0 : i32
    %c0_i32_0 = arith.constant 0 : i32
    %c0_i32_1 = arith.constant 0 : i32
    return %arg0, %c0_i32, %c0_i32_0 : i32, i32, i32
  }
}

</mosaic_0001>

<bundles_post_ra>
// kernel: search_share_stage_forward.1
= control target key start
LH: loop header
LB: loop body
LE: loop exit
PB: predicated region body
PF: predicated region fallthrough
CT: control target
= control target key end

     0   :  { %s5560_s0 = inlined_call_operand.vmem [shape: f32[2,3], index: 0, kind: input, shape index: {}]   ;;  %s5561_s1 = inlined_call_operand.vmem [shape: bf16[512,36], index: 1, kind: input, shape index: {}]   ;;  %s5562_s2 = inlined_call_operand.vmem [shape: bf16[36,32], index: 2, kind: input, shape index: {}]   ;;  %s5563_s3 = inlined_call_operand.vmem [shape: f32[1,32], index: 3, kind: input, shape index: {}]   ;;  %s5564_s4 = inlined_call_operand.vmem [shape: f32[1,32], index: 4, kind: input, shape index: {}]   ;;  %s5565_s5 = inlined_call_operand.vmem [shape: bf16[2,32,32], index: 5, kind: input, shape index: {}]   ;;  %s5566_s6 = inlined_call_operand.vmem [shape: f32[2,1,32], index: 6, kind: input, shape index: {}]   ;;  %s5567_s7 = inlined_call_operand.vmem [shape: f32[2,1,32], index: 7, kind: input, shape index: {}]   ;;  %s5568_s8 = inlined_call_operand.vmem [shape: bf16[64,256], index: 8, kind: input, shape index: {}]   ;;  %s5569_s9 = inlined_call_operand.vmem [shape: bf16[32,64], index: 9, kind: input, shape index: {}]   ;;  %s5570_s10 = inlined_call_operand.vmem [shape: f32[1,64], index: 10, kind: input, shape index: {}]   ;;  %s5571_s11 = inlined_call_operand.vmem [shape: f32[1,64], index: 11, kind: input, shape index: {}]   ;;  %s5572_s12 = inlined_call_operand.vmem [shape: bf16[2,64,64], index: 12, kind: input, shape index: {}]   ;;  %s5573_s13 = inlined_call_operand.vmem [shape: f32[2,1,64], index: 13, kind: input, shape index: {}]   ;;  %s5574_s14 = inlined_call_operand.vmem [shape: f32[2,1,64], index: 14, kind: input, shape index: {}]   ;;  %s5575_s15 = inlined_call_operand.vmem [shape: bf16[16,64], index: 15, kind: input, shape index: {}]   ;;  %s5576_s16 = inlined_call_operand.vmem [shape: bf16[64,128], index: 16, kind: input, shape index: {}]   ;;  %s5577_s17 = inlined_call_operand.vmem [shape: f32[1,128], index: 17, kind: input, shape index: {}]   ;;  %s5578_s18 = inlined_call_operand.vmem [shape: f32[1,128], index: 18, kind: input, shape index: {}]   ;;  %s5579_s19 = inlined_call_operand.vmem [shape: bf16[2,128,128], index: 19, kind: input, shape index: {}]   ;;  %s5580_s20 = inlined_call_operand.vmem [shape: f32[2,1,128], index: 20, kind: input, shape index: {}]   ;;  %s5581_s21 = inlined_call_operand.vmem [shape: f32[2,1,128], index: 21, kind: input, shape index: {}]   ;;  %s5582_s22 = inlined_call_operand.vmem [shape: bf16[128,128], index: 22, kind: input, shape index: {}]   ;;  %s5583_s23 = inlined_call_operand.vmem [shape: f32[1,128], index: 23, kind: input, shape index: {}]   ;;  %s5584_s24 = inlined_call_operand.hbm [shape: f32[2,1,128], index: 24, kind: output, shape index: {}]  }
   0x1   :  { %5599 = sst [smem:[#allocation13_spill]] %s5560_s0 }
   0x2   :  { %5600 = sst [smem:[#allocation14_spill]] %s5561_s1 }
   0x3   :  { %5601 = sst [smem:[#allocation15_spill]] %s5562_s2 }
   0x4   :  { %5602 = sst [smem:[#allocation16_spill]] %s5563_s3 }
   0x5   :  { %5603 = sst [smem:[#allocation17_spill]] %s5564_s4 }
   0x6   :  { %5604 = sst [smem:[#allocation18_spill]] %s5565_s5 }
   0x7   :  { %5605 = sst [smem:[#allocation19_spill]] %s5566_s6 }
   0x8   :  { %5606 = sst [smem:[#allocation20_spill]] %s5567_s7 }
   0x9   :  { %5607 = sst [smem:[#allocation21_spill]] %s5568_s8 }
   0xa   :  { %29 = vsyncpa [#allocation4], 0 }
   0xb   :  { %30 = vsyncpa [#allocation3], 0 }
   0xc   :  { %32 = vsyncpa [#allocation3 + $0x1], 0  ;;  %s4337_s5 = smov 0   ;;  %s4339_s26 = smov 0  }
   0xd   :  { %s4341_s27 = smov 0   ;;  %s4343_s28 = smov 0  }
   0xe LB: > { %5608 = sst [smem:[#allocation8_spill]] %s4194_s5  ;;  %s4358_s6 = sadd.s32 4294967295, %s4206_s28   ;;  %s4206_s28 = sphi %s4343_s28, %s5629_s28   ;;  %s4202_s27 = sphi %s4341_s27, %s5631_s27   ;;  %s4198_s26 = sphi %s4339_s26, %s5633_s26   ;;  %s4194_s5 = sphi %s4337_s5, %s5632_s5  }
   0xf   : > { %5609 = sst [smem:[#allocation9_spill]] %s4202_s27  ;;  %s3400_s2 = sadd.s32 4294967294, %s4206_s28  }
  0x10   : > { %s4362_s29 = sadd.s32 1, %s4206_s28   ;;  %s554_s0 = sadd.s32 1, %s4202_s27 }
  0x11   : > { %5610 = sst [smem:[#allocation10_spill]] %s4362_s29  ;;  %s551_s7 = ssub.s32 %s4206_s28, %s4362_s29 }
  0x12   : > { %p564_p0 = scmp.ne.s32.totalorder %s4202_s27, %s4198_s26  ;;  %p552_p1 = scmp.eq.s32.totalorder %s551_s7, 0 }
  0x13   : > { %p565_p2 = scmp.eq.s32.totalorder %s4358_s6, 1  ;;  %p570_p3 = scmp.ne.s32.totalorder %s4198_s26, %s4194_s5 }
  0x14   : > { %p571_p4 = scmp.eq.s32.totalorder %s3400_s2, 1  ;;  %p3401_p7 = scmp.ge.s32.totalorder %s4206_s28, 1 }
  0x15   : > { %s4373_s30 = scalar_select %p552_p1, %s4202_s27, %s554_s0  }
  0x16   : > { %p4375_p5 = por %p565_p2, %p564_p0  ;;  %p4379_p6 = por %p571_p4, %p570_p3 }
  0x17   : > { %5611 = sst [smem:[#allocation11_spill]] %s4373_s30  ;;  %p578_p8 = scmp.lt.s32.totalorder %s4206_s28, 3 }
  0x18   : > { %s5613_s25 = scalar_select %p4379_p6, 1, 0 }
  0x19   : > { %p4013_p9 = scmp.eq.s32.totalorder %s4358_s6, 0  ;;  %p4386_p10 = pnand %p3401_p7, %p578_p8 }
  0x1a   : > { %5614 = sst [smem:[#allocation12_spill]] %s5613_s25  ;;  %s5616_s2 = sld [smem:[#allocation13_spill]] }
  0x1b   : > { %p4005_p11 = pneg %p4386_p10 }
  0x1d   : > { %p4006_p12 = pnand %p4013_p9, %p4005_p11 }
  0x1f   : > { %p4127_p0 = pneg %p4006_p12 }
  0x20   : > { %s591_s0 = sshll.u32 %s5616_s2, 4  ;;  %s592_s0 = int_to_ptr.vmem [resolvable:$true] %s591_s0 }
  0x21   : > { %s4125_s7 = scalar_lea.vmem %s592_s0, 32  ;;  %p4133_p3 = scmp.lt.s32.totalorder %s592_s0, %s592_s0 }
  0x22   : > { %p4126_p13 = scmp.ne.s32.totalorder %s592_s0, %s4125_s7  ;;  %p4134_p4 = scmp.lt.s32.totalorder %s4125_s7, %s4125_s7 }
  0x24   : > { %p4128_p1 = pnand %p4127_p0, %p4126_p13  ;;  %p4135_p7 = por %p4134_p4, %p4133_p3 }
  0x26   : > { %p4129_p2 = pneg %p4128_p1 }
  0x28   : > { %p4136_p8 = pnand %p4135_p7, %p4129_p2 }
  0x2a   : > { %4139 = shalt.err (!%p4136_p8)
}
  0x2b   : > { %s4208_s30 = smov [#allocation2]   ;;  %679 = sbr.rel (%p4386_p10) target bundleno = 2876 (0xb3c), region = 116 }
  0x2c   : > { %4008 = dma.vmem_to_smem (!%p4006_p12), %s592_s0, 32, %s4208_s30, [#allocation4]  }
  0x32   : > { %4185 = dma.done.wait (%p4013_p9), [#allocation4], 32  }
  0x33   : > { %4187 = vsyncadd (%p4013_p9), [#allocation4], 4294967264 }
  0x34   : > { %685 = sfence }
  0x35   : > { %s5617_s2 = sld [smem:[#allocation15_spill]]  ;;  %s3406_s30 = sshll.u32 %s4358_s6, 5  ;;  %vm938_vm0 = vcmask 1041408   ;;  %vm889_vm1 = vcmask 293888   ;;  %vm1343_vm2 = vcmask 261120   ;;  %vm2480_vm3 = vcmask 523264  }
  0x36   : > { %p746_p11 = scmp.lt.s32.totalorder %s3406_s30, 63  ;;  %s5618_s27 = sld [smem:[#allocation14_spill]]  ;;  %vm4210_vm4 = vmmov 0  }
  0x37   : > { %s5619_s8 = sld [smem:[#allocation18_spill]]  ;;  %s3410_s1 = sld [smem:[#allocation2 + $0x81]] }
  0x38   : > { %s5635_s30 = smov (!%p746_p11, %s3406_s30), 63  ;;  %s5623_s5 = sld [smem:[#allocation20_spill]] }
  0x39   : > { %s3407_s4 = sshll.u32 %s5635_s30, 2  ;;  %s5620_s30 = sld [smem:[#allocation16_spill]] }
  0x3b   : > { %v4051_v0 = vld [vmem:[%s5617_s2] sm:$0xff]   ;;  %v4052_v1 = vld [vmem:[%s5617_s2 + $0x8] sm:$0xff]   ;;  %v4053_v2 = vld [vmem:[%s5617_s2 + $0x10] ss:$0 sps:$4 sm:$0x33]   ;;  %s3408_s2 = sld [smem:[#allocation2 + $0x1]] }
  0x3c   : > { %3753 = vmatprep.subr.bf16.mxu0 %v4051_v0  ;;  %3991 = vmatprep.subr.bf16.mxu1 %v4051_v0  ;;  %s4416_s7 = scalar_lea.vmem %s5618_s27, %s3407_s4  ;;  %v940_v3 = vsel %vm938_vm0, %v4053_v2, 0  ;;  %s5621_s4 = sld [smem:[#allocation17_spill]] }
  0x3d   : > { %3754 = vmatpush3.bf16.msra.mxu0 %v4051_v0  ;;  %3994 = vmatpush3.bf16.msra.mxu1 %v4051_v0  ;;  %v4054_v4 = vld [vmem:[%s4416_s7] sm:$0xff]   ;;  %v4055_v5 = vld [vmem:[%s4416_s7 + $0x8] sm:$0xff]   ;;  %v4056_v6 = vld [vmem:[%s4416_s7 + $0x10] sm:$0xff]   ;;  %s3411_s27 = sld [smem:[#allocation2 + $0x82]] }
  0x3e   : > { %3755 = vmatprep.subr.bf16.mxu0 %v4052_v1  ;;  %3992 = vmatprep.subr.bf16.mxu1 %v4052_v1  ;;  %v4057_v7 = vld [vmem:[%s4416_s7 + $0x18] sm:$0xff]   ;;  %v4058_v8 = vld [vmem:[%s4416_s7 + $0x20] sm:$0xff]   ;;  %v4068_v9 = vld [vmem:[%s4416_s7 + $0x70] sm:$0xff]   ;;  %s5624_s25 = smov %s5623_s5 }
  0x3f   : > { %3759 = vmatprep.mubr.msk.bf16.mxu0 %vm889_vm1, %v4054_v4  ;;  %v4069_v10 = vld [vmem:[%s4416_s7 + $0x78] sm:$0xff]   ;;  %v4059_v11 = vld [vmem:[%s4416_s7 + $0x28] sm:$0xff]   ;;  %3787 = vmatprep.mubr.msk.bf16.mxu1 %vm889_vm1, %v4068_v9  ;;  %v4060_v12 = vld [vmem:[%s4416_s7 + $0x30] sm:$0xff]  }
  0x40   : > { %v4061_v13 = vld [vmem:[%s4416_s7 + $0x38] sm:$0xff]   ;;  %v4062_v14 = vld [vmem:[%s4416_s7 + $0x40] sm:$0xff]   ;;  %v4063_v15 = vld [vmem:[%s4416_s7 + $0x48] sm:$0xff]  }
  0x41   : > { %3756 = vmatpush3.bf16.msra.mxu0 %v4052_v1  ;;  %3995 = vmatpush3.bf16.msra.mxu1 %v4052_v1  ;;  %v4064_v16 = vld [vmem:[%s4416_s7 + $0x50] sm:$0xff]   ;;  %v4065_v17 = vld [vmem:[%s4416_s7 + $0x58] sm:$0xff]   ;;  %v4066_v18 = vld [vmem:[%s4416_s7 + $0x60] sm:$0xff]   ;;  %v4475_v29 = vstv %s3408_s2  ;;  %s3409_s2 = sld [smem:[#allocation2 + $0x80]] }
  0x42   : > { %3997 = vmatprep.subr.msk.bf16.mxu0 %vm938_vm0, %v4053_v2  ;;  %3998 = vmatprep.subr.msk.bf16.mxu1 %vm938_vm0, %v4053_v2  ;;  %v4067_v19 = vld [vmem:[%s4416_s7 + $0x68] sm:$0xff]   ;;  %v4070_v20 = vld [vmem:[%s5619_s8] sm:$0xff]   ;;  %v4459_v22 = vld [vmem:[%s5619_s8 + $0x10] sm:$0xff]   ;;  %s752_s7 = sld [smem:[#allocation2]] }
  0x43   : > { %v4071_v21 = vld [vmem:[%s5619_s8 + $0x8] sm:$0xff]   ;;  %v4465_v23 = vld [vmem:[%s5620_s30] ss:$0 sm:$0xff]  ;;  %s5622_s30 = sld [smem:[#allocation19_spill]] }
  0x44   : > { %v4470_v25 = vld [vmem:[%s5621_s4] ss:$0 sm:$0xff]  ;;  %s743_s4 = sand.u32 1, %s4198_s26  }
  0x45   : > { %3758 = vmatpush3.bf16.msra.mxu0 %v940_v3  ;;  %3996 = vmatpush3.bf16.msra.mxu1 %v940_v3 }
  0x46   : > { %3791 = vmatprep.subr.bf16.mxu1 %v4070_v20 }
  0x48   : > { %3760 = vmatmul.mubr.msk.bf16.vlgmr.msra.gmra.mrb[0].mxu0 %vm889_vm1, %v4055_v5  ;;  %3788 = vmatmul.mubr.msk.bf16.vlgmr.msra.gmra.mrb[0].mxu1 %vm889_vm1, %v4069_v10  ;;  %v4473_v28 = vstv %s752_s7 }
  0x49   : > { %3763 = vmatprep.mubr.msk.bf16.mxu0 %vm889_vm1, %v4056_v6  ;;  %3792 = vmatpush3.bf16.msra.mxu1 %v4070_v20 }
  0x4a   : > { %3793 = vmatprep.subr.bf16.mxu1 %v4071_v21 }
  0x4d   : > { %3794 = vmatpush3.bf16.msra.mxu1 %v4071_v21 }
  0x4e   : > { %3827 = vmatprep.subr.bf16.mxu1 %v4459_v22 }
  0x50   : > { %3764 = vmatmul.mubr.msk.bf16.gmra.mrb[4].mxu0 %vm889_vm1, %v4057_v7 }
  0x51   : > { %3767 = vmatprep.mubr.msk.bf16.mxu0 %vm889_vm1, %v4058_v8 }
  0x58   : > { %3768 = vmatmul.mubr.msk.bf16.gmra.mrb[8].mxu0 %vm889_vm1, %v4059_v11 }
  0x59   : > { %3771 = vmatprep.mubr.msk.bf16.mxu0 %vm889_vm1, %v4060_v12 }
  0x60   : > { %3772 = vmatmul.mubr.msk.bf16.gmra.mrb[12].mxu0 %vm889_vm1, %v4061_v13 }
  0x61   : > { %3775 = vmatprep.mubr.msk.bf16.mxu0 %vm889_vm1, %v4062_v14 }
  0x68   : > { %3776 = vmatmul.mubr.msk.bf16.gmra.mrb[16].mxu0 %vm889_vm1, %v4063_v15 }
  0x69   : > { %3779 = vmatprep.mubr.msk.bf16.mxu0 %vm889_vm1, %v4064_v16 }
  0x70   : > { %3780 = vmatmul.mubr.msk.bf16.gmra.mrb[20].mxu0 %vm889_vm1, %v4065_v17 }
  0x71   : > { %3783 = vmatprep.mubr.msk.bf16.mxu0 %vm889_vm1, %v4066_v18 }
  0x78   : > { %3784 = vmatmul.mubr.msk.bf16.gmra.mrb[24].mxu0 %vm889_vm1, %v4067_v19 }
 0x11b   : > { %v3761_v24 = vpop.f32.mrb[0].mxu0  ;;  %v3789_v62 = vpop.f32.mrb[0].mxu1 }
 0x11c   : > { %v1112_v26 = vmul.f32 %v3761_v24, %v4465_v23  ;;  %v976_v27 = vpop.f32.mrb[1].mxu0  ;;  %v1140_v2 = vmul.f32 %v3789_v62, %v4465_v23  ;;  %v1088_v3 = vpop.f32.mrb[1].mxu1 }
 0x11d   : > { %v1110_v30 = vmul.f32 %v4465_v23, %v976_v27  ;;  %v3762_v31 = vpop.f32.mrb[2].mxu0  ;;  %v3790_v8 = vpop.f32.mrb[2].mxu1  ;;  %v1138_v24 = vmul.f32 %v4465_v23, %v1088_v3 }
 0x11e   : > { %v4479_v32 = vadd.f32 %v4470_v25, %v1112_v26  ;;  %v1113_v33 = vmul.f32 %v3762_v31, %v4465_v23  ;;  %v979_v34 = vpop.f32.mrb[3].mxu0  ;;  %v1091_v13 = vpop.f32.mrb[3].mxu1  ;;  %v4538_v17 = vadd.f32 %v4470_v25, %v1140_v2 }
 0x11f   : > { %v4483_v35 = vadd.f32 %v4470_v25, %v1110_v30  ;;  %v1111_v36 = vmul.f32 %v4465_v23, %v979_v34 }
 0x120   : > { %v1184_v37 = vmul.f32 %v4473_v28, %v4479_v32  ;;  %v1217_v38 = vmul.f32 %v4475_v29, %v4479_v32  ;;  %v4491_v39 = vadd.f32 %v4470_v25, %v1113_v33  ;;  %v4550_v33 = vmul.f32 %v4473_v28, %v4538_v17 }
 0x121   : > { %v1182_v40 = vmul.f32 %v4473_v28, %v4483_v35  ;;  %v1215_v41 = vmul.f32 %v4475_v29, %v4483_v35  ;;  %v4498_v42 = vadd.f32 %v4470_v25, %v1111_v36 }
 0x122   : > { %v1249_v43 = vadd.f32 %v1217_v38, %v1184_v37  ;;  %v1185_v44 = vmul.f32 %v4473_v28, %v4491_v39  ;;  %v1218_v45 = vmul.f32 %v4475_v29, %v4491_v39 }
 0x123   : > { %v1183_v46 = vmul.f32 %v4473_v28, %v4498_v42  ;;  %v1216_v47 = vmul.f32 %v4475_v29, %v4498_v42  ;;  %v3765_v48 = vpop.f32.mrb[4].mxu0  ;;  %v1247_v49 = vadd.f32 %v1215_v41, %v1182_v40  ;;  %v4555_v40 = vmul.f32 %v4475_v29, %v4538_v17 }
 0x124   : > { %v1250_v50 = vadd.f32 %v1218_v45, %v1185_v44  ;;  %v1116_v51 = vmul.f32 %v3765_v48, %v4465_v23  ;;  %v992_v52 = vpop.f32.mrb[5].mxu0  ;;  %v1281_v53 = vmax.f32 %v1249_v43, 0.0 }
 0x125   : > { %v1114_v54 = vmul.f32 %v4465_v23, %v992_v52  ;;  %v3766_v55 = vpop.f32.mrb[6].mxu0  ;;  %v1248_v56 = vadd.f32 %v1216_v47, %v1183_v46  ;;  %v1279_v61 = vmax.f32 %v1247_v49, 0.0  ;;  %v4563_v46 = vadd.f32 %v4470_v25, %v1138_v24 }
 0x126   : > { %v1282_v57 = vmax.f32 %v1250_v50, 0.0  ;;  %v4511_v58 = vadd.f32 %v4470_v25, %v1116_v51  ;;  %v1117_v59 = vmul.f32 %v3766_v55, %v4465_v23  ;;  %v995_v60 = vpop.f32.mrb[7].mxu0  ;;  %v1141_v50 = vmul.f32 %v3790_v8, %v4465_v23 }
 0x127   : > { %v4515_v63 = vadd.f32 %v4470_v25, %v1114_v54  ;;  %v1115_v0 = vmul.f32 %v4465_v23, %v995_v60  ;;  %v1280_v1 = vmax.f32 %v1248_v56, 0.0  ;;  %v1210_v62 = vmul.f32 %v4473_v28, %v4563_v46 }
 0x128   : > { %v1188_v4 = vmul.f32 %v4473_v28, %v4511_v58  ;;  %v1221_v5 = vmul.f32 %v4475_v29, %v4511_v58  ;;  %v4524_v6 = vadd.f32 %v4470_v25, %v1117_v59  ;;  %v1312_v7 = vpack.c.bf16 %v1282_v57, %v1281_v53 }
 0x129   : > { %v1186_v9 = vmul.f32 %v4473_v28, %v4515_v63  ;;  %v1219_v10 = vmul.f32 %v4475_v29, %v4515_v63  ;;  %v4531_v11 = vadd.f32 %v4470_v25, %v1115_v0  ;;  %v1311_v12 = vpack.c.bf16 %v1280_v1, %v1279_v61 }
 0x12a   : > { %v1189_v14 = vmul.f32 %v4473_v28, %v4524_v6  ;;  %v1222_v15 = vmul.f32 %v4475_v29, %v4524_v6  ;;  %v1253_v16 = vadd.f32 %v1221_v5, %v1188_v4  ;;  %v1243_v4 = vmul.f32 %v4475_v29, %v4563_v46 }
 0x12b   : > { %v1187_v18 = vmul.f32 %v4473_v28, %v4531_v11  ;;  %v1220_v19 = vmul.f32 %v4475_v29, %v4531_v11  ;;  %v3769_v20 = vpop.f32.mrb[8].mxu0  ;;  %3795 = vmatprep.mubr.msk.bf16.mxu1 %vm1343_vm2, %v1311_v12  ;;  %v1251_v21 = vadd.f32 %v1219_v10, %v1186_v9  ;;  %v4600_v10 = vadd.f32 %v4470_v25, %v1141_v50 }
 0x12c   : > { %v1120_v26 = vmul.f32 %v3769_v20, %v4465_v23  ;;  %v1008_v27 = vpop.f32.mrb[9].mxu0  ;;  %3796 = vmatmul.mubr.msk.bf16.vlgmr.msra.gmra.mrb[4].mxu1 %vm1343_vm2, %v1312_v7  ;;  %v1254_v30 = vadd.f32 %v1222_v15, %v1189_v14  ;;  %v1285_v31 = vmax.f32 %v1253_v16, 0.0 }
 0x12d   : > { %v1118_v34 = vmul.f32 %v4465_v23, %v1008_v27  ;;  %v3770_v36 = vpop.f32.mrb[10].mxu0  ;;  %v1252_v37 = vadd.f32 %v1220_v19, %v1187_v18  ;;  %v1283_v38 = vmax.f32 %v1251_v21, 0.0  ;;  %3828 = vmatpush3.bf16.msra.mxu1 %v4459_v22  ;;  %v1139_v18 = vmul.f32 %v4465_v23, %v1091_v13 }
 0x12e   : > { %v4559_v41 = vadd.f32 %v4470_v25, %v1120_v26  ;;  %v1121_v43 = vmul.f32 %v3770_v36, %v4465_v23  ;;  %v1011_v44 = vpop.f32.mrb[11].mxu0  ;;  %v1286_v45 = vmax.f32 %v1254_v30, 0.0  ;;  %v4610_v26 = vmul.f32 %v4473_v28, %v4600_v10 }
 0x12f   : > { %v4566_v47 = vadd.f32 %v4470_v25, %v1118_v34  ;;  %v1119_v48 = vmul.f32 %v4465_v23, %v1011_v44  ;;  %v1284_v49 = vmax.f32 %v1252_v37, 0.0  ;;  %v4618_v13 = vmul.f32 %v4475_v29, %v4600_v10 }
 0x130   : > { %v1192_v22 = vmul.f32 %v4473_v28, %v4559_v41  ;;  %v1225_v51 = vmul.f32 %v4475_v29, %v4559_v41  ;;  %v4575_v52 = vadd.f32 %v4470_v25, %v1121_v43  ;;  %v1314_v53 = vpack.c.bf16 %v1286_v45, %v1285_v31 }
 0x131   : > { %v1190_v54 = vmul.f32 %v4473_v28, %v4566_v47  ;;  %v1223_v55 = vmul.f32 %v4475_v29, %v4566_v47  ;;  %v4582_v56 = vadd.f32 %v4470_v25, %v1119_v48  ;;  %v1313_v57 = vpack.c.bf16 %v1284_v49, %v1283_v38 }
 0x132   : > { %v1193_v59 = vmul.f32 %v4473_v28, %v4575_v52  ;;  %v1226_v60 = vmul.f32 %v4475_v29, %v4575_v52  ;;  %v1257_v61 = vadd.f32 %v1225_v51, %v1192_v22  ;;  %v4639_v51 = vadd.f32 %v4470_v25, %v1139_v18 }
 0x133   : > { %v1191_v0 = vmul.f32 %v4473_v28, %v4582_v56  ;;  %v1224_v1 = vmul.f32 %v4475_v29, %v4582_v56  ;;  %v3773_v2 = vpop.f32.mrb[12].mxu0  ;;  %3799 = vmatprep.mubr.msk.bf16.mxu1 %vm1343_vm2, %v1313_v57  ;;  %v1255_v3 = vadd.f32 %v1223_v55, %v1190_v54 }
 0x134   : > { %v1124_v5 = vmul.f32 %v3773_v2, %v4465_v23  ;;  %v1024_v7 = vpop.f32.mrb[13].mxu0  ;;  %3800 = vmatmul.mubr.msk.bf16.gmra.mrb[8].mxu1 %vm1343_vm2, %v1314_v53  ;;  %v1258_v8 = vadd.f32 %v1226_v60, %v1193_v59  ;;  %v1289_v9 = vmax.f32 %v1257_v61, 0.0  ;;  %v1275_v59 = vadd.f32 %v1243_v4, %v1210_v62 }
 0x135   : > { %v1122_v12 = vmul.f32 %v4465_v23, %v1024_v7  ;;  %v3774_v14 = vpop.f32.mrb[14].mxu0  ;;  %v1256_v15 = vadd.f32 %v1224_v1, %v1191_v0  ;;  %v1287_v16 = vmax.f32 %v1255_v3, 0.0  ;;  %v1211_v2 = vmul.f32 %v4473_v28, %v4639_v51 }
 0x136   : > { %v4605_v19 = vadd.f32 %v4470_v25, %v1124_v5  ;;  %v1125_v20 = vmul.f32 %v3774_v14, %v4465_v23  ;;  %v1027_v21 = vpop.f32.mrb[15].mxu0  ;;  %v1290_v24 = vmax.f32 %v1258_v8, 0.0 }
 0x137   : > { %v4613_v27 = vadd.f32 %v4470_v25, %v1122_v12  ;;  %v1123_v30 = vmul.f32 %v4465_v23, %v1027_v21  ;;  %v1288_v31 = vmax.f32 %v1256_v15, 0.0  ;;  %v1307_v15 = vmax.f32 %v1275_v59, 0.0 }
 0x138   : > { %v1196_v34 = vmul.f32 %v4473_v28, %v4605_v19  ;;  %v1229_v36 = vmul.f32 %v4475_v29, %v4605_v19  ;;  %v4625_v37 = vadd.f32 %v4470_v25, %v1125_v20  ;;  %v1316_v38 = vpack.c.bf16 %v1290_v24, %v1289_v9 }
 0x139   : > { %v1194_v43 = vmul.f32 %v4473_v28, %v4613_v27  ;;  %v1227_v44 = vmul.f32 %v4475_v29, %v4613_v27  ;;  %v4632_v45 = vadd.f32 %v4470_v25, %v1123_v30  ;;  %v1315_v48 = vpack.c.bf16 %v1288_v31, %v1287_v16 }
 0x13a   : > { %v1197_v49 = vmul.f32 %v4473_v28, %v4625_v37  ;;  %v1230_v50 = vmul.f32 %v4475_v29, %v4625_v37  ;;  %v1261_v22 = vadd.f32 %v1229_v36, %v1196_v34  ;;  %v1244_v9 = vmul.f32 %v4475_v29, %v4639_v51 }
 0x13b   : > { %v1195_v53 = vmul.f32 %v4473_v28, %v4632_v45  ;;  %v1228_v54 = vmul.f32 %v4475_v29, %v4632_v45  ;;  %v3777_v55 = vpop.f32.mrb[16].mxu0  ;;  %3803 = vmatprep.mubr.msk.bf16.mxu1 %vm1343_vm2, %v1315_v48  ;;  %v1259_v57 = vadd.f32 %v1227_v44, %v1194_v43  ;;  %v1277_v59 = vadd.f32 %v4555_v40, %v4550_v33 }
 0x13c   : > { %v1128_v60 = vmul.f32 %v3777_v55, %v4465_v23  ;;  %v1040_v61 = vpop.f32.mrb[17].mxu0  ;;  %3804 = vmatmul.mubr.msk.bf16.gmra.mrb[12].mxu1 %vm1343_vm2, %v1316_v38  ;;  %v1262_v0 = vadd.f32 %v1230_v50, %v1197_v49  ;;  %v1293_v1 = vmax.f32 %v1261_v22, 0.0  ;;  %v1276_v21 = vadd.f32 %v1244_v9, %v1211_v2 }
 0x13d   : > { %v1126_v3 = vmul.f32 %v4465_v23, %v1040_v61  ;;  %v3778_v5 = vpop.f32.mrb[18].mxu0  ;;  %v1260_v7 = vadd.f32 %v1228_v54, %v1195_v53  ;;  %v1291_v8 = vmax.f32 %v1259_v57, 0.0  ;;  %v1278_v9 = vadd.f32 %v4618_v13, %v4610_v26 }
 0x13e   : > { %v4654_v62 = vadd.f32 %v4470_v25, %v1128_v60  ;;  %v1129_v4 = vmul.f32 %v3778_v5, %v4465_v23  ;;  %v1043_v12 = vpop.f32.mrb[19].mxu0  ;;  %v1294_v14 = vmax.f32 %v1262_v0, 0.0  ;;  %v1308_v22 = vmax.f32 %v1276_v21, 0.0 }
 0x13f   : > { %v4658_v16 = vadd.f32 %v4470_v25, %v1126_v3  ;;  %v1127_v18 = vmul.f32 %v4465_v23, %v1043_v12  ;;  %v1292_v20 = vmax.f32 %v1260_v7, 0.0  ;;  %v1310_v21 = vmax.f32 %v1278_v9, 0.0 }
 0x140   : > { %v1200_v24 = vmul.f32 %v4473_v28, %v4654_v62  ;;  %v1233_v30 = vmul.f32 %v4475_v29, %v4654_v62  ;;  %v4666_v31 = vadd.f32 %v4470_v25, %v1129_v4  ;;  %v1318_v34 = vpack.c.bf16 %v1294_v14, %v1293_v1 }
 0x141   : > { %v1198_v36 = vmul.f32 %v4473_v28, %v4658_v16  ;;  %v1231_v38 = vmul.f32 %v4475_v29, %v4658_v16  ;;  %v4673_v43 = vadd.f32 %v4470_v25, %v1127_v18  ;;  %v1317_v44 = vpack.c.bf16 %v1292_v20, %v1291_v8 }
 0x142   : > { %v1201_v48 = vmul.f32 %v4473_v28, %v4666_v31  ;;  %v1234_v49 = vmul.f32 %v4475_v29, %v4666_v31  ;;  %v1265_v50 = vadd.f32 %v1233_v30, %v1200_v24  ;;  %v4688_v2 = vpack.c.bf16 %v1308_v22, %v1307_v15 }
 0x143   : > { %v1199_v53 = vmul.f32 %v4473_v28, %v4673_v43  ;;  %v1232_v54 = vmul.f32 %v4475_v29, %v4673_v43  ;;  %v3781_v55 = vpop.f32.mrb[20].mxu0  ;;  %3807 = vmatprep.mubr.msk.bf16.mxu1 %vm1343_vm2, %v1317_v44  ;;  %v1263_v57 = vadd.f32 %v1231_v38, %v1198_v36  ;;  %v1309_v14 = vmax.f32 %v1277_v59, 0.0 }
 0x144   : > { %v1132_v60 = vmul.f32 %v3781_v55, %v4465_v23  ;;  %v1056_v61 = vpop.f32.mrb[21].mxu0  ;;  %3808 = vmatmul.mubr.msk.bf16.gmra.mrb[16].mxu1 %vm1343_vm2, %v1318_v34  ;;  %v1266_v0 = vadd.f32 %v1234_v49, %v1201_v48  ;;  %v1297_v1 = vmax.f32 %v1265_v50, 0.0 }
 0x145   : > { %v1130_v3 = vmul.f32 %v4465_v23, %v1056_v61  ;;  %v3782_v5 = vpop.f32.mrb[22].mxu0  ;;  %v1264_v7 = vadd.f32 %v1232_v54, %v1199_v53  ;;  %v1295_v8 = vmax.f32 %v1263_v57, 0.0  ;;  %v1326_v22 = vpack.c.bf16 %v1310_v21, %v1309_v14 }
 0x146   : > { %v4694_v4 = vadd.f32 %v4470_v25, %v1132_v60  ;;  %v1133_v33 = vmul.f32 %v3782_v5, %v4465_v23  ;;  %v1059_v40 = vpop.f32.mrb[23].mxu0  ;;  %v1298_v12 = vmax.f32 %v1266_v0, 0.0 }
 0x147   : > { %v4698_v18 = vadd.f32 %v4470_v25, %v1130_v3  ;;  %v1131_v15 = vmul.f32 %v4465_v23, %v1059_v40  ;;  %v1296_v20 = vmax.f32 %v1264_v7, 0.0 }
 0x148   : > { %v1204_v24 = vmul.f32 %v4473_v28, %v4694_v4  ;;  %v1237_v26 = vmul.f32 %v4475_v29, %v4694_v4  ;;  %v4706_v13 = vadd.f32 %v4470_v25, %v1133_v33  ;;  %v1320_v30 = vpack.c.bf16 %v1298_v12, %v1297_v1 }
 0x149   : > { %v1202_v34 = vmul.f32 %v4473_v28, %v4698_v18  ;;  %v1235_v36 = vmul.f32 %v4475_v29, %v4698_v18  ;;  %v4713_v38 = vadd.f32 %v4470_v25, %v1131_v15  ;;  %v1319_v44 = vpack.c.bf16 %v1296_v20, %v1295_v8 }
 0x14a   : > { %v1205_v48 = vmul.f32 %v4473_v28, %v4706_v13  ;;  %v1238_v49 = vmul.f32 %v4475_v29, %v4706_v13  ;;  %v1269_v50 = vadd.f32 %v1237_v26, %v1204_v24 }
 0x14b   : > { %v1203_v53 = vmul.f32 %v4473_v28, %v4713_v38  ;;  %v1236_v54 = vmul.f32 %v4475_v29, %v4713_v38  ;;  %v3785_v55 = vpop.f32.mrb[24].mxu0  ;;  %3811 = vmatprep.mubr.msk.bf16.mxu1 %vm1343_vm2, %v1319_v44  ;;  %v1267_v57 = vadd.f32 %v1235_v36, %v1202_v34 }
 0x14c   : > { %v1136_v59 = vmul.f32 %v3785_v55, %v4465_v23  ;;  %v1072_v60 = vpop.f32.mrb[25].mxu0  ;;  %3812 = vmatmul.mubr.msk.bf16.gmra.mrb[20].mxu1 %vm1343_vm2, %v1320_v30  ;;  %v1270_v61 = vadd.f32 %v1238_v49, %v1205_v48  ;;  %v1301_v9 = vmax.f32 %v1269_v50, 0.0 }
 0x14d   : > { %v1134_v0 = vmul.f32 %v4465_v23, %v1072_v60  ;;  %v3786_v1 = vpop.f32.mrb[26].mxu0  ;;  %v1268_v3 = vadd.f32 %v1236_v54, %v1203_v53  ;;  %v1299_v14 = vmax.f32 %v1267_v57, 0.0 }
 0x14e   : > { %v4728_v5 = vadd.f32 %v4470_v25, %v1136_v59  ;;  %v1137_v7 = vmul.f32 %v3786_v1, %v4465_v23  ;;  %v1075_v8 = vpop.f32.mrb[27].mxu0  ;;  %v1302_v33 = vmax.f32 %v1270_v61, 0.0 }
 0x14f   : > { %v4732_v40 = vadd.f32 %v4470_v25, %v1134_v0  ;;  %v1135_v12 = vmul.f32 %v4465_v23, %v1075_v8  ;;  %v1300_v15 = vmax.f32 %v1268_v3, 0.0  ;;  %v4073_v3 = vld [vmem:[%s5619_s8 + $0x18] sm:$0xff]   ;;  %v4769_v8 = vstv %s3410_s1  ;;  %s3321_s8 = scalar_lea.sflag [#allocation3], %s743_s4 }
 0x150   : > { %v1208_v20 = vmul.f32 %v4473_v28, %v4728_v5  ;;  %v1241_v21 = vmul.f32 %v4475_v29, %v4728_v5  ;;  %v4740_v24 = vadd.f32 %v4470_v25, %v1137_v7  ;;  %v1322_v26 = vpack.c.bf16 %v1302_v33, %v1301_v9  ;;  %3829 = vmatprep.subr.bf16.mxu1 %v4073_v3 }
 0x151   : > { %v1206_v30 = vmul.f32 %v4473_v28, %v4732_v40  ;;  %v1239_v34 = vmul.f32 %v4475_v29, %v4732_v40  ;;  %v4747_v23 = vadd.f32 %v4470_v25, %v1135_v12  ;;  %v1321_v36 = vpack.c.bf16 %v1300_v15, %v1299_v14  ;;  %3830 = vmatpush3.bf16.msra.mxu1 %v4073_v3 }
 0x152   : > { %v1209_v44 = vmul.f32 %v4473_v28, %v4740_v24  ;;  %v1242_v48 = vmul.f32 %v4475_v29, %v4740_v24  ;;  %v1273_v49 = vadd.f32 %v1241_v21, %v1208_v20  ;;  %v4767_v7 = vstv %s3409_s2  ;;  %s744_s2 = scalar_lea.vmem [#allocation5], %s743_s4 }
 0x153   : > { %v1207_v50 = vmul.f32 %v4473_v28, %v4747_v23  ;;  %v1240_v53 = vmul.f32 %v4475_v29, %v4747_v23  ;;  %3815 = vmatprep.mubr.msk.bf16.mxu1 %vm1343_vm2, %v1321_v36  ;;  %v1271_v54 = vadd.f32 %v1239_v34, %v1206_v30  ;;  %v1634_v9 = vmul.f32 %v4767_v7, %v4479_v32  ;;  %s3333_s1 = sshll.u32 %s744_s2, 4  ;;  %s5520_s1 = int_to_ptr.vmem [resolvable:$true] %s3333_s1 }
 0x154   : > { %3816 = vmatmul.mubr.msk.bf16.gmra.mrb[24].mxu1 %vm1343_vm2, %v1322_v26  ;;  %v1274_v25 = vadd.f32 %v1242_v48, %v1209_v44  ;;  %v1305_v57 = vmax.f32 %v1273_v49, 0.0  ;;  %v1665_v33 = vmul.f32 %v4769_v8, %v4483_v35  ;;  %v1635_v12 = vmul.f32 %v4767_v7, %v4491_v39 }
 0x155   : > { %v1272_v55 = vadd.f32 %v1240_v53, %v1207_v50  ;;  %v1303_v60 = vmax.f32 %v1271_v54, 0.0  ;;  %v1668_v14 = vmul.f32 %v4769_v8, %v4491_v39  ;;  %v1633_v15 = vmul.f32 %v4767_v7, %v4498_v42 }
 0x156   : > { %v1306_v59 = vmax.f32 %v1274_v25, 0.0  ;;  %v1666_v20 = vmul.f32 %v4769_v8, %v4498_v42  ;;  %v1638_v42 = vmul.f32 %v4767_v7, %v4511_v58  ;;  %v1671_v48 = vmul.f32 %v4769_v8, %v4511_v58 }
 0x157   : > { %v1304_v61 = vmax.f32 %v1272_v55, 0.0  ;;  %v1700_v39 = vadd.f32 %v1668_v14, %v1635_v12  ;;  %v4802_v49 = vstv %s3411_s27  ;;  %v1636_v54 = vmul.f32 %v4767_v7, %v4515_v63  ;;  %s5625_s27 = sld [smem:[#allocation21_spill]] }
 0x158   : > { %v1324_v0 = vpack.c.bf16 %v1306_v59, %v1305_v57  ;;  %v1698_v44 = vadd.f32 %v1666_v20, %v1633_v15  ;;  %v1669_v25 = vmul.f32 %v4769_v8, %v4515_v63  ;;  %v1672_v58 = vmul.f32 %v4769_v8, %v4524_v6 }
 0x159   : > { %v1323_v1 = vpack.c.bf16 %v1304_v61, %v1303_v60  ;;  %v1639_v60 = vmul.f32 %v4767_v7, %v4524_v6  ;;  %v1670_v63 = vmul.f32 %v4769_v8, %v4531_v11  ;;  %v1675_v6 = vmul.f32 %v4769_v8, %v4559_v41 }
 0x15a   : > { %v1703_v12 = vadd.f32 %v1671_v48, %v1638_v42  ;;  %v1701_v14 = vadd.f32 %v1669_v25, %v1636_v54 }
 0x15b   : > { %3819 = vmatprep.mubr.msk.bf16.mxu1 %vm1343_vm2, %v1323_v1  ;;  %v1637_v1 = vmul.f32 %v4767_v7, %v4531_v11  ;;  %v1704_v11 = vadd.f32 %v1672_v58, %v1639_v60  ;;  %v1641_v60 = vmul.f32 %v4767_v7, %v4582_v56 }
 0x15c   : > { %3820 = vmatmul.mubr.msk.bf16.gmra.mrb[28].mxu1 %vm1343_vm2, %v1324_v0 }
 0x15d   : > { %3823 = vmatprep.mubr.msk.bf16.mxu1 %vm1343_vm2, %v4688_v2  ;;  %v1667_v2 = vmul.f32 %v4769_v8, %v4479_v32  ;;  %v4790_v32 = vld [vmem:[%s5622_s30] ss:$0 sm:$0xff]  ;;  %s5626_s7 = smov %s5625_s27 }
 0x15f   : > { %v1699_v26 = vadd.f32 %v1667_v2, %v1634_v9  ;;  %v1642_v2 = vmul.f32 %v4767_v7, %v4559_v41  ;;  %v1673_v41 = vmul.f32 %v4769_v8, %v4566_v47 }
 0x161   : > { %v1707_v48 = vadd.f32 %v1675_v6, %v1642_v2  ;;  %v1674_v6 = vmul.f32 %v4769_v8, %v4582_v56  ;;  %v1644_v56 = vmul.f32 %v4767_v7, %v4613_v27 }
 0x164   : > { %3824 = vmatmul.mubr.msk.bf16.gmra.mrb[32].mxu1 %vm1343_vm2, %v1326_v22  ;;  %v1632_v22 = vmul.f32 %v4767_v7, %v4483_v35  ;;  %v4795_v35 = vld [vmem:[%s5623_s5] ss:$0 sm:$0xff]  ;;  %s4211_s5 = smov [#allocation5]  }
 0x166   : > { %v1697_v30 = vadd.f32 %v1665_v33, %v1632_v22 }
 0x1ff   : > { %v3797_v21 = vpop.f32.mrb[4].mxu1 }
 0x200   : > { %v1562_v34 = vmul.f32 %v3797_v21, %v4790_v32  ;;  %v1426_v36 = vpop.f32.mrb[5].mxu1  ;;  %v1640_v21 = vmul.f32 %v4767_v7, %v4566_v47 }
 0x201   : > { %v1560_v50 = vmul.f32 %v4790_v32, %v1426_v36  ;;  %v3798_v53 = vpop.f32.mrb[6].mxu1 }
 0x202   : > { %v1601_v55 = vadd.f32 %v4795_v35, %v1562_v34  ;;  %v1563_v57 = vmul.f32 %v3798_v53, %v4790_v32  ;;  %v1429_v59 = vpop.f32.mrb[7].mxu1  ;;  %v1702_v53 = vadd.f32 %v1670_v63, %v1637_v1 }
 0x203   : > { %v1599_v61 = vadd.f32 %v4795_v35, %v1560_v50  ;;  %v1561_v0 = vmul.f32 %v4790_v32, %v1429_v59 }
 0x204   : > { %v1732_v3 = vmul.f32 %v4802_v49, %v1601_v55  ;;  %v1602_v9 = vadd.f32 %v4795_v35, %v1563_v57 }
 0x205   : > { %v1730_v22 = vmul.f32 %v4802_v49, %v1599_v61  ;;  %v1600_v33 = vadd.f32 %v4795_v35, %v1561_v0 }
 0x206   : > { %v1764_v15 = vadd.f32 %v1732_v3, %v1699_v26  ;;  %v1733_v20 = vmul.f32 %v4802_v49, %v1602_v9  ;;  %v1643_v26 = vmul.f32 %v4767_v7, %v4575_v52 }
 0x207   : > { %v1762_v34 = vadd.f32 %v1730_v22, %v1697_v30  ;;  %v1731_v36 = vmul.f32 %v4802_v49, %v1600_v33  ;;  %v3801_v50 = vpop.f32.mrb[8].mxu1  ;;  %v1676_v30 = vmul.f32 %v4769_v8, %v4575_v52 }
 0x208   : > { %v1765_v55 = vadd.f32 %v1733_v20, %v1700_v39  ;;  %v1566_v57 = vmul.f32 %v3801_v50, %v4790_v32  ;;  %v1442_v42 = vpop.f32.mrb[9].mxu1  ;;  %v1796_v58 = vmax.f32 %v1764_v15, 0.0  ;;  %v1705_v20 = vadd.f32 %v1673_v41, %v1640_v21 }
 0x209   : > { %v1763_v54 = vadd.f32 %v1731_v36, %v1698_v44  ;;  %v1564_v25 = vmul.f32 %v4790_v32, %v1442_v42  ;;  %v3802_v59 = vpop.f32.mrb[10].mxu1  ;;  %v1794_v1 = vmax.f32 %v1762_v34, 0.0  ;;  %v1646_v50 = vmul.f32 %v4767_v7, %v4605_v19 }
 0x20a   : > { %v1797_v47 = vmax.f32 %v1765_v55, 0.0  ;;  %v1605_v39 = vadd.f32 %v4795_v35, %v1566_v57  ;;  %v1567_v61 = vmul.f32 %v3802_v59, %v4790_v32  ;;  %v1445_v0 = vpop.f32.mrb[11].mxu1  ;;  %v1679_v55 = vmul.f32 %v4769_v8, %v4605_v19 }
 0x20b   : > { %v1795_v63 = vmax.f32 %v1763_v54, 0.0  ;;  %v1603_v44 = vadd.f32 %v4795_v35, %v1564_v25  ;;  %v1565_v3 = vmul.f32 %v4790_v32, %v1445_v0  ;;  %v1708_v59 = vadd.f32 %v1676_v30, %v1643_v26 }
 0x20c   : > { %v1827_v9 = vpack.c.bf16 %v1797_v47, %v1796_v58  ;;  %v1736_v2 = vmul.f32 %v4802_v49, %v1605_v39  ;;  %v1606_v52 = vadd.f32 %v4795_v35, %v1567_v61  ;;  %v1706_v19 = vadd.f32 %v1674_v6, %v1641_v60 }
 0x20d   : > { %v1734_v22 = vmul.f32 %v4802_v49, %v1603_v44  ;;  %v1604_v33 = vadd.f32 %v4795_v35, %v1565_v3  ;;  %v1826_v15 = vpack.c.bf16 %v1795_v63, %v1794_v1  ;;  %v1647_v39 = vmul.f32 %v4767_v7, %v4625_v37 }
 0x20e   : > { %v1768_v34 = vadd.f32 %v1736_v2, %v1703_v12  ;;  %v1737_v36 = vmul.f32 %v4802_v49, %v1606_v52  ;;  %v1677_v12 = vmul.f32 %v4769_v8, %v4613_v27  ;;  %v1680_v61 = vmul.f32 %v4769_v8, %v4625_v37 }
 0x20f   : > { %v1766_v57 = vadd.f32 %v1734_v22, %v1701_v14  ;;  %v1735_v42 = vmul.f32 %v4802_v49, %v1604_v33  ;;  %v3805_v54 = vpop.f32.mrb[12].mxu1  ;;  %3831 = vmatprep.mubr.msk.bf16.mxu1 %vm1343_vm2, %v1826_v15  ;;  %v1645_v37 = vmul.f32 %v4767_v7, %v4632_v45  ;;  %v1678_v22 = vmul.f32 %v4769_v8, %v4632_v45 }
 0x210   : > { %v1769_v21 = vadd.f32 %v1737_v36, %v1704_v11  ;;  %v1570_v41 = vmul.f32 %v3805_v54, %v4790_v32  ;;  %v1458_v25 = vpop.f32.mrb[13].mxu1  ;;  %3832 = vmatmul.mubr.msk.bf16.vlgmr.msra.gmra.mrb[36].mxu1 %vm1343_vm2, %v1827_v9  ;;  %v1800_v0 = vmax.f32 %v1768_v34, 0.0  ;;  %v1711_v34 = vadd.f32 %v1679_v55, %v1646_v50 }
 0x211   : > { %v1767_v14 = vadd.f32 %v1735_v42, %v1702_v53  ;;  %v1568_v58 = vmul.f32 %v4790_v32, %v1458_v25  ;;  %v3806_v47 = vpop.f32.mrb[14].mxu1  ;;  %v1798_v44 = vmax.f32 %v1766_v57, 0.0  ;;  %v1709_v36 = vadd.f32 %v1677_v12, %v1644_v56 }
 0x212   : > { %v1801_v27 = vmax.f32 %v1769_v21, 0.0  ;;  %v1609_v11 = vadd.f32 %v4795_v35, %v1570_v41  ;;  %v1571_v1 = vmul.f32 %v3806_v47, %v4790_v32  ;;  %v1461_v63 = vpop.f32.mrb[15].mxu1  ;;  %v1712_v21 = vadd.f32 %v1680_v61, %v1647_v39 }
 0x213   : > { %v1799_v26 = vmax.f32 %v1767_v14, 0.0  ;;  %v1607_v53 = vadd.f32 %v4795_v35, %v1568_v58  ;;  %v1569_v30 = vmul.f32 %v4790_v32, %v1461_v63  ;;  %v1650_v41 = vmul.f32 %v4767_v7, %v4654_v62 }
 0x214   : > { %v1740_v60 = vmul.f32 %v4802_v49, %v1609_v11  ;;  %v1610_v3 = vadd.f32 %v4795_v35, %v1571_v1  ;;  %v1829_v9 = vpack.c.bf16 %v1801_v27, %v1800_v0  ;;  %v1683_v45 = vmul.f32 %v4769_v8, %v4654_v62 }
 0x215   : > { %v1738_v2 = vmul.f32 %v4802_v49, %v1607_v53  ;;  %v1608_v52 = vadd.f32 %v4795_v35, %v1569_v30  ;;  %v1828_v6 = vpack.c.bf16 %v1799_v26, %v1798_v44  ;;  %v1710_v56 = vadd.f32 %v1678_v22, %v1645_v37 }
 0x216   : > { %v1772_v33 = vadd.f32 %v1740_v60, %v1707_v48  ;;  %v1741_v15 = vmul.f32 %v4802_v49, %v1610_v3  ;;  %v1648_v48 = vmul.f32 %v4767_v7, %v4658_v16  ;;  %v1681_v12 = vmul.f32 %v4769_v8, %v4658_v16 }
 0x217   : > { %v1770_v57 = vadd.f32 %v1738_v2, %v1705_v20  ;;  %v1739_v42 = vmul.f32 %v4802_v49, %v1608_v52  ;;  %v3809_v54 = vpop.f32.mrb[16].mxu1  ;;  %3835 = vmatprep.mubr.msk.bf16.mxu1 %vm1343_vm2, %v1828_v6  ;;  %v1651_v16 = vmul.f32 %v4767_v7, %v4666_v31  ;;  %v1684_v60 = vmul.f32 %v4769_v8, %v4666_v31 }
 0x218   : > { %v1773_v25 = vadd.f32 %v1741_v15, %v1708_v59  ;;  %v1574_v14 = vmul.f32 %v3809_v54, %v4790_v32  ;;  %v1474_v58 = vpop.f32.mrb[17].mxu1  ;;  %3836 = vmatmul.mubr.msk.bf16.gmra.mrb[40].mxu1 %vm1343_vm2, %v1829_v9  ;;  %v1804_v59 = vmax.f32 %v1772_v33, 0.0  ;;  %v1715_v37 = vadd.f32 %v1683_v45, %v1650_v41 }
 0x219   : > { %v1771_v20 = vadd.f32 %v1739_v42, %v1706_v19  ;;  %v1572_v50 = vmul.f32 %v4790_v32, %v1474_v58  ;;  %v3810_v55 = vpop.f32.mrb[18].mxu1  ;;  %v1802_v27 = vmax.f32 %v1770_v57, 0.0  ;;  %v1649_v2 = vmul.f32 %v4767_v7, %v4673_v43 }
 0x21a   : > { %v1805_v47 = vmax.f32 %v1773_v25, 0.0  ;;  %v1613_v39 = vadd.f32 %v4795_v35, %v1574_v14  ;;  %v1575_v61 = vmul.f32 %v3810_v55, %v4790_v32  ;;  %v1477_v0 = vpop.f32.mrb[19].mxu1  ;;  %v1682_v33 = vmul.f32 %v4769_v8, %v4673_v43 }
 0x21b   : > { %v1803_v62 = vmax.f32 %v1771_v20, 0.0  ;;  %v1611_v11 = vadd.f32 %v4795_v35, %v1572_v50  ;;  %v1573_v19 = vmul.f32 %v4790_v32, %v1477_v0  ;;  %v1654_v15 = vmul.f32 %v4767_v7, %v4694_v4 }
 0x21c   : > { %v1744_v1 = vmul.f32 %v4802_v49, %v1613_v39  ;;  %v1614_v63 = vadd.f32 %v4795_v35, %v1575_v61  ;;  %v1831_v44 = vpack.c.bf16 %v1805_v47, %v1804_v59  ;;  %v1713_v42 = vadd.f32 %v1681_v12, %v1648_v48 }
 0x21d   : > { %v1742_v26 = vmul.f32 %v4802_v49, %v1611_v11  ;;  %v1612_v53 = vadd.f32 %v4795_v35, %v1573_v19  ;;  %v1830_v30 = vpack.c.bf16 %v1803_v62, %v1802_v27  ;;  %v1652_v43 = vmul.f32 %v4767_v7, %v4698_v18 }
 0x21e   : > { %v1776_v3 = vadd.f32 %v1744_v1, %v1711_v34  ;;  %v1745_v9 = vmul.f32 %v4802_v49, %v1614_v63  ;;  %v1685_v14 = vmul.f32 %v4769_v8, %v4698_v18  ;;  %v1655_v18 = vmul.f32 %v4767_v7, %v4706_v13 }
 0x21f   : > { %v1774_v52 = vadd.f32 %v1742_v26, %v1709_v36  ;;  %v1743_v6 = vmul.f32 %v4802_v49, %v1612_v53  ;;  %v3813_v22 = vpop.f32.mrb[20].mxu1  ;;  %3839 = vmatprep.mubr.msk.bf16.mxu1 %vm1343_vm2, %v1830_v30  ;;  %v1687_v36 = vmul.f32 %v4769_v8, %v4694_v4  ;;  %v1688_v27 = vmul.f32 %v4769_v8, %v4706_v13 }
 0x220   : > { %v1777_v31 = vadd.f32 %v1745_v9, %v1712_v21  ;;  %v1578_v34 = vmul.f32 %v3813_v22, %v4790_v32  ;;  %v1490_v57 = vpop.f32.mrb[21].mxu1  ;;  %3840 = vmatmul.mubr.msk.bf16.gmra.mrb[44].mxu1 %vm1343_vm2, %v1831_v44  ;;  %v1808_v21 = vmax.f32 %v1776_v3, 0.0  ;;  %v1716_v11 = vadd.f32 %v1684_v60, %v1651_v16 }
 0x221   : > { %v1775_v54 = vadd.f32 %v1743_v6, %v1710_v56  ;;  %v1576_v41 = vmul.f32 %v4790_v32, %v1490_v57  ;;  %v3814_v25 = vpop.f32.mrb[22].mxu1  ;;  %v1806_v50 = vmax.f32 %v1774_v52, 0.0  ;;  %v1714_v1 = vadd.f32 %v1682_v33, %v1649_v2 }
 0x222   : > { %v1809_v58 = vmax.f32 %v1777_v31, 0.0  ;;  %v1617_v45 = vadd.f32 %v4795_v35, %v1578_v34  ;;  %v1579_v48 = vmul.f32 %v3814_v25, %v4790_v32  ;;  %v1493_v20 = vpop.f32.mrb[23].mxu1  ;;  %v1719_v53 = vadd.f32 %v1687_v36, %v1654_v15 }
 0x223   : > { %v1807_v55 = vmax.f32 %v1775_v54, 0.0  ;;  %v1615_v4 = vadd.f32 %v4795_v35, %v1576_v41  ;;  %v1577_v56 = vmul.f32 %v4790_v32, %v1493_v20  ;;  %v1653_v30 = vmul.f32 %v4767_v7, %v4713_v38 }
 0x224   : > { %v1748_v12 = vmul.f32 %v4802_v49, %v1617_v45  ;;  %v1618_v59 = vadd.f32 %v4795_v35, %v1579_v48  ;;  %v1833_v47 = vpack.c.bf16 %v1809_v58, %v1808_v21  ;;  %v1686_v13 = vmul.f32 %v4769_v8, %v4713_v38 }
 0x225   : > { %v1746_v39 = vmul.f32 %v4802_v49, %v1615_v4  ;;  %v1616_v61 = vadd.f32 %v4795_v35, %v1577_v56  ;;  %v1832_v0 = vpack.c.bf16 %v1807_v55, %v1806_v50  ;;  %v1658_v16 = vmul.f32 %v4767_v7, %v4728_v5 }
 0x226   : > { %v1780_v62 = vadd.f32 %v1748_v12, %v1715_v37  ;;  %v1749_v19 = vmul.f32 %v4802_v49, %v1618_v59  ;;  %v1717_v2 = vadd.f32 %v1685_v14, %v1652_v43  ;;  %v1720_v22 = vadd.f32 %v1688_v27, %v1655_v18 }
 0x227   : > { %v1778_v63 = vadd.f32 %v1746_v39, %v1713_v42  ;;  %v1747_v44 = vmul.f32 %v4802_v49, %v1616_v61  ;;  %v3817_v26 = vpop.f32.mrb[24].mxu1  ;;  %3843 = vmatprep.mubr.msk.bf16.mxu1 %vm1343_vm2, %v1832_v0  ;;  %v1691_v43 = vmul.f32 %v4769_v8, %v4728_v5  ;;  %v1656_v48 = vmul.f32 %v4767_v7, %v4732_v40 }
 0x228   : > { %v1781_v3 = vadd.f32 %v1749_v19, %v1716_v11  ;;  %v1582_v9 = vmul.f32 %v3817_v26, %v4790_v32  ;;  %v1506_v52 = vpop.f32.mrb[25].mxu1  ;;  %3844 = vmatmul.mubr.msk.bf16.gmra.mrb[48].mxu1 %vm1343_vm2, %v1833_v47  ;;  %v1812_v33 = vmax.f32 %v1780_v62, 0.0  ;;  %v1718_v55 = vadd.f32 %v1686_v13, %v1653_v30 }
 0x229   : > { %v1779_v60 = vadd.f32 %v1747_v44, %v1714_v1  ;;  %v1580_v37 = vmul.f32 %v4790_v32, %v1506_v52  ;;  %v3818_v6 = vpop.f32.mrb[26].mxu1  ;;  %v1810_v42 = vmax.f32 %v1778_v63, 0.0  ;;  %v1689_v4 = vmul.f32 %v4769_v8, %v4732_v40 }
 0x22a   : > { %v1813_v15 = vmax.f32 %v1781_v3, 0.0  ;;  %v1621_v31 = vadd.f32 %v4795_v35, %v1582_v9  ;;  %v1583_v34 = vmul.f32 %v3818_v6, %v4790_v32  ;;  %v1509_v57 = vpop.f32.mrb[27].mxu1  ;;  %v1659_v59 = vmul.f32 %v4767_v7, %v4740_v24 }
 0x22b   : > { %v1811_v36 = vmax.f32 %v1779_v60, 0.0  ;;  %v1619_v38 = vadd.f32 %v4795_v35, %v1580_v37  ;;  %v1581_v54 = vmul.f32 %v4790_v32, %v1509_v57  ;;  %v1692_v47 = vmul.f32 %v4769_v8, %v4740_v24 }
 0x22c   : > { %v1752_v41 = vmul.f32 %v4802_v49, %v1621_v31  ;;  %v1622_v25 = vadd.f32 %v4795_v35, %v1583_v34  ;;  %v1835_v14 = vpack.c.bf16 %v1813_v15, %v1812_v33  ;;  %v1723_v61 = vadd.f32 %v1691_v43, %v1658_v16 }
 0x22d   : > { %v1750_v21 = vmul.f32 %v4802_v49, %v1619_v38  ;;  %v1620_v58 = vadd.f32 %v4795_v35, %v1581_v54  ;;  %v1834_v45 = vpack.c.bf16 %v1811_v36, %v1810_v42  ;;  %v1657_v40 = vmul.f32 %v4767_v7, %v4747_v23 }
 0x22e   : > { %v1784_v20 = vadd.f32 %v1752_v41, %v1719_v53  ;;  %v1753_v50 = vmul.f32 %v4802_v49, %v1622_v25  ;;  %v1690_v19 = vmul.f32 %v4769_v8, %v4747_v23  ;;  %v1662_v24 = vmul.f32 %v4767_v7, %v4538_v17 }
 0x22f   : > { %v1782_v56 = vadd.f32 %v1750_v21, %v1717_v2  ;;  %v1751_v12 = vmul.f32 %v4802_v49, %v1620_v58  ;;  %v3821_v5 = vpop.f32.mrb[28].mxu1  ;;  %3847 = vmatprep.mubr.msk.bf16.mxu1 %vm1343_vm2, %v1834_v45  ;;  %v1721_v16 = vadd.f32 %v1689_v4, %v1656_v48  ;;  %v1724_v2 = vadd.f32 %v1692_v47, %v1659_v59 }
 0x230   : > { %v1785_v18 = vadd.f32 %v1753_v50, %v1720_v22  ;;  %v1586_v39 = vmul.f32 %v3821_v5, %v4790_v32  ;;  %v1522_v0 = vpop.f32.mrb[29].mxu1  ;;  %3848 = vmatmul.mubr.msk.bf16.gmra.mrb[52].mxu1 %vm1343_vm2, %v1835_v14  ;;  %v1816_v1 = vmax.f32 %v1784_v20, 0.0  ;;  %v1695_v31 = vmul.f32 %v4769_v8, %v4538_v17 }
 0x231   : > { %v1783_v27 = vadd.f32 %v1751_v12, %v1718_v55  ;;  %v1584_v62 = vmul.f32 %v4790_v32, %v1522_v0  ;;  %v3822_v11 = vpop.f32.mrb[30].mxu1  ;;  %v1814_v30 = vmax.f32 %v1782_v56, 0.0  ;;  %v1660_v34 = vmul.f32 %v4767_v7, %v4563_v46 }
 0x232   : > { %v1817_v63 = vmax.f32 %v1785_v18, 0.0  ;;  %v1625_v44 = vadd.f32 %v4795_v35, %v1586_v39  ;;  %v1587_v26 = vmul.f32 %v3822_v11, %v4790_v32  ;;  %v1525_v53 = vpop.f32.mrb[31].mxu1  ;;  %v1722_v42 = vadd.f32 %v1690_v19, %v1657_v40 }
 0x233   : > { %v1815_v3 = vmax.f32 %v1783_v27, 0.0  ;;  %v1623_v9 = vadd.f32 %v4795_v35, %v1584_v62  ;;  %v1585_v52 = vmul.f32 %v4790_v32, %v1525_v53  ;;  %v1693_v54 = vmul.f32 %v4769_v8, %v4563_v46 }
 0x234   : > { %v1756_v13 = vmul.f32 %v4802_v49, %v1625_v44  ;;  %v1626_v23 = vadd.f32 %v4795_v35, %v1587_v26  ;;  %v1837_v60 = vpack.c.bf16 %v1817_v63, %v1816_v1  ;;  %v1663_v17 = vmul.f32 %v4767_v7, %v4600_v10 }
 0x235   : > { %v1754_v37 = vmul.f32 %v4802_v49, %v1623_v9  ;;  %v1624_v6 = vadd.f32 %v4795_v35, %v1585_v52  ;;  %v1836_v22 = vpack.c.bf16 %v1815_v3, %v1814_v30  ;;  %v1696_v14 = vmul.f32 %v4769_v8, %v4600_v10  ;;  %v4076_v52 = vld [vmem:[%s5625_s27 + $0x4] ss:$8 sps:$4 sm:$0xff]  }
 0x236   : > { %v1788_v33 = vadd.f32 %v1756_v13, %v1723_v61  ;;  %v1757_v15 = vmul.f32 %v4802_v49, %v1626_v23  ;;  %v1661_v48 = vmul.f32 %v4767_v7, %v4639_v51  ;;  %v1694_v46 = vmul.f32 %v4769_v8, %v4639_v51  ;;  %2244 = vmatprep.mubr.bf16.mxu0 %v4076_v52  ;;  %v5029_v13 = vld [vmem:[%s5622_s30 + $0x1] ss:$0 sm:$0xff]  ;;  %s4144_s30 = sshll.u32 %s4211_s5, 4  ;;  %s4145_s30 = int_to_ptr.vmem [resolvable:$false] %s4144_s30 }
 0x237   : > { %v1786_v57 = vadd.f32 %v1754_v37, %v1721_v16  ;;  %v1755_v36 = vmul.f32 %v4802_v49, %v1624_v6  ;;  %v3825_v38 = vpop.f32.mrb[32].mxu1  ;;  %3851 = vmatprep.mubr.msk.bf16.mxu1 %vm1343_vm2, %v1836_v22  ;;  %v1727_v47 = vadd.f32 %v1695_v31, %v1662_v24  ;;  %v1725_v51 = vadd.f32 %v1693_v54, %v1660_v34  ;;  %v5035_v37 = vld [vmem:[%s5624_s25 + $0x1] ss:$0 sm:$0xff]  ;;  %s3596_s25 = sshll.u32 %s4358_s6, 4  ;;  %s4140_s6 = scalar_lea.vmem %s5520_s1, 16 }
 0x238   : > { %v1789_v41 = vadd.f32 %v1757_v15, %v1724_v2  ;;  %v1590_v25 = vmul.f32 %v3825_v38, %v4790_v32  ;;  %v1538_v43 = vpop.f32.mrb[33].mxu1  ;;  %3852 = vmatmul.mubr.msk.bf16.gmra.mrb[56].mxu1 %vm1343_vm2, %v1837_v60  ;;  %v1820_v20 = vmax.f32 %v1788_v33, 0.0  ;;  %v1728_v11 = vadd.f32 %v1696_v14, %v1663_v17  ;;  %s5518_s0 = scalar_lea.hbm %s5584_s24, %s3596_s25  ;;  %p4141_p9 = scmp.ne.s32.totalorder %s5520_s1, %s4140_s6 }
 0x239   : > { %v1787_v21 = vadd.f32 %v1755_v36, %v1722_v42  ;;  %v1588_v58 = vmul.f32 %v4790_v32, %v1538_v43  ;;  %v3826_v45 = vpop.f32.mrb[34].mxu1  ;;  %v1818_v12 = vmax.f32 %v1786_v57, 0.0  ;;  %v1726_v63 = vadd.f32 %v1694_v46, %v1661_v48  ;;  %s4146_s27 = scalar_lea.vmem %s4145_s30, 32  ;;  %p4147_p13 = scmp.lt.s32.totalorder %s5520_s1, %s4145_s30 }
 0x23a   : > { %v1821_v50 = vmax.f32 %v1789_v41, 0.0  ;;  %v1629_v55 = vadd.f32 %v4795_v35, %v1590_v25  ;;  %v1591_v4 = vmul.f32 %v3826_v45, %v4790_v32  ;;  %v1541_v56 = vpop.f32.mrb[35].mxu1  ;;  %p4142_p10 = pnand %p4141_p9, %p4375_p5  ;;  %p4148_p0 = scmp.lt.s32.totalorder %s4146_s27, %s4140_s6 }
 0x23b   : > { %v1819_v5 = vmax.f32 %v1787_v21, 0.0  ;;  %v1627_v10 = vadd.f32 %v4795_v35, %v1588_v58  ;;  %v1589_v59 = vmul.f32 %v4790_v32, %v1541_v56 }
 0x23c   : > { %v1760_v18 = vmul.f32 %v4802_v49, %v1629_v55  ;;  %v1630_v39 = vadd.f32 %v4795_v35, %v1591_v4  ;;  %v1839_v61 = vpack.c.bf16 %v1821_v50, %v1820_v20  ;;  %p4143_p12 = pneg %p4142_p10  ;;  %p4149_p1 = por %p4148_p0, %p4147_p13 }
 0x23d   : > { %v1758_v0 = vmul.f32 %v4802_v49, %v1627_v10  ;;  %v1628_v40 = vadd.f32 %v4795_v35, %v1589_v59  ;;  %v1838_v27 = vpack.c.bf16 %v1819_v5, %v1818_v12 }
 0x23e   : > { %v1792_v62 = vadd.f32 %v1760_v18, %v1727_v47  ;;  %v1761_v19 = vmul.f32 %v4802_v49, %v1630_v39  ;;  %p4150_p2 = pnand %p4149_p1, %p4143_p12 }
 0x23f   : > { %v1790_v1 = vadd.f32 %v1758_v0, %v1725_v51  ;;  %v1759_v32 = vmul.f32 %v4802_v49, %v1628_v40  ;;  %3855 = vmatprep.mubr.msk.bf16.mxu1 %vm1343_vm2, %v1838_v27 }
 0x240   : > { %v1793_v24 = vadd.f32 %v1761_v19, %v1728_v11  ;;  %3856 = vmatmul.mubr.msk.bf16.gmra.mrb[60].mxu1 %vm1343_vm2, %v1839_v61  ;;  %v1824_v26 = vmax.f32 %v1792_v62, 0.0 }
 0x241   : > { %v1791_v44 = vadd.f32 %v1759_v32, %v1726_v63  ;;  %v1822_v30 = vmax.f32 %v1790_v1, 0.0 }
 0x242   : > { %v1825_v53 = vmax.f32 %v1793_v24, 0.0 }
 0x243   : > { %v1823_v3 = vmax.f32 %v1791_v44, 0.0 }
 0x244   : > { %v1841_v35 = vpack.c.bf16 %v1825_v53, %v1824_v26 }
 0x245   : > { %v1840_v9 = vpack.c.bf16 %v1823_v3, %v1822_v30 }
 0x247   : > { %3859 = vmatprep.mubr.msk.bf16.mxu1 %vm1343_vm2, %v1840_v9 }
 0x248   : > { %3860 = vmatmul.mubr.msk.bf16.gmra.mrb[64].mxu1 %vm1343_vm2, %v1841_v35 }
 0x2e3   : > { %v3833_v16 = vpop.f32.mrb[36].mxu1 }
 0x2e4   : > { %v2078_v23 = vmul.f32 %v3833_v16, %v5029_v13  ;;  %v1941_v60 = vpop.f32.mrb[37].mxu1 }
 0x2e5   : > { %v2076_v2 = vmul.f32 %v5029_v13, %v1941_v60  ;;  %v3834_v6 = vpop.f32.mrb[38].mxu1 }
 0x2e6   : > { %v2079_v22 = vmul.f32 %v3834_v6, %v5029_v13  ;;  %v1944_v33 = vpop.f32.mrb[39].mxu1  ;;  %v5041_v31 = vadd.f32 %v5035_v37, %v2078_v23 }
 0x2e7   : > { %v2077_v15 = vmul.f32 %v5029_v13, %v1944_v33  ;;  %v5047_v57 = vadd.f32 %v5035_v37, %v2076_v2 }
 0x2e8   : > { %v5044_v34 = vadd.f32 %v5035_v37, %v2079_v22 }
 0x2e9   : > { %v5050_v42 = vadd.f32 %v5035_v37, %v2077_v15 }
 0x2ea   : > { %v2157_v36 = vpack.c.bf16 %v5044_v34, %v5041_v31 }
 0x2eb   : > { %v2156_v38 = vpack.c.bf16 %v5050_v42, %v5047_v57  ;;  %v3837_v54 = vpop.f32.mrb[40].mxu1 }
 0x2ec   : > { %v2082_v41 = vmul.f32 %v3837_v54, %v5029_v13  ;;  %v1957_v25 = vpop.f32.mrb[41].mxu1 }
 0x2ed   : > { %v2080_v43 = vmul.f32 %v5029_v13, %v1957_v25  ;;  %v3838_v17 = vpop.f32.mrb[42].mxu1 }
 0x2ee   : > { %v2083_v14 = vmul.f32 %v3838_v17, %v5029_v13  ;;  %v1960_v21 = vpop.f32.mrb[43].mxu1  ;;  %v5061_v45 = vadd.f32 %v5035_v37, %v2082_v41 }
 0x2ef   : > { %v2081_v58 = vmul.f32 %v5029_v13, %v1960_v21  ;;  %v5067_v46 = vadd.f32 %v5035_v37, %v2080_v43 }
 0x2f0   : > { %v5064_v48 = vadd.f32 %v5035_v37, %v2083_v14 }
 0x2f1   : > { %v5070_v20 = vadd.f32 %v5035_v37, %v2081_v58 }
 0x2f2   : > { %v2159_v50 = vpack.c.bf16 %v5064_v48, %v5061_v45 }
 0x2f3   : > { %v2158_v55 = vpack.c.bf16 %v5070_v20, %v5067_v46  ;;  %v3841_v4 = vpop.f32.mrb[44].mxu1 }
 0x2f4   : > { %v2086_v56 = vmul.f32 %v3841_v4, %v5029_v13  ;;  %v1973_v12 = vpop.f32.mrb[45].mxu1 }
 0x2f5   : > { %v2084_v5 = vmul.f32 %v5029_v13, %v1973_v12  ;;  %v3842_v10 = vpop.f32.mrb[46].mxu1 }
 0x2f6   : > { %v2087_v59 = vmul.f32 %v3842_v10, %v5029_v13  ;;  %v1976_v47 = vpop.f32.mrb[47].mxu1  ;;  %v5081_v39 = vadd.f32 %v5035_v37, %v2086_v56 }
 0x2f7   : > { %v2085_v18 = vmul.f32 %v5029_v13, %v1976_v47  ;;  %v5087_v51 = vadd.f32 %v5035_v37, %v2084_v5 }
 0x2f8   : > { %v5084_v61 = vadd.f32 %v5035_v37, %v2087_v59 }
 0x2f9   : > { %v5090_v0 = vadd.f32 %v5035_v37, %v2085_v18 }
 0x2fa   : > { %v2161_v40 = vpack.c.bf16 %v5084_v61, %v5081_v39  ;;  %v4079_v39 = vld [vmem:[%s5626_s7 + $0x10] ss:$8 sps:$4 sm:$0xff]   ;;  %v4080_v61 = vld [vmem:[%s5626_s7 + $0x24] ss:$8 sps:$4 sm:$0xff]  }
 0x2fb   : > { %v2160_v27 = vpack.c.bf16 %v5090_v0, %v5087_v51  ;;  %v3845_v62 = vpop.f32.mrb[48].mxu1  ;;  %v4082_v51 = vld [vmem:[%s5626_s7 + $0x20] ss:$8 sps:$4 sm:$0xff]   ;;  %v4083_v0 = vld [vmem:[%s5626_s7 + $0x34] ss:$8 sps:$4 sm:$0xff]  }
 0x2fc   : > { %v2090_v11 = vmul.f32 %v3845_v62, %v5029_v13  ;;  %v1989_v19 = vpop.f32.mrb[49].mxu1 }
 0x2fd   : > { %v2088_v1 = vmul.f32 %v5029_v13, %v1989_v19  ;;  %v3846_v63 = vpop.f32.mrb[50].mxu1 }
 0x2fe   : > { %v2091_v32 = vmul.f32 %v3846_v63, %v5029_v13  ;;  %v1992_v24 = vpop.f32.mrb[51].mxu1  ;;  %v5101_v26 = vadd.f32 %v5035_v37, %v2090_v11 }
 0x2ff   : > { %v2089_v44 = vmul.f32 %v5029_v13, %v1992_v24  ;;  %v5107_v30 = vadd.f32 %v5035_v37, %v2088_v1 }
 0x300   : > { %v5104_v53 = vadd.f32 %v5035_v37, %v2091_v32 }
 0x301   : > { %v5110_v3 = vadd.f32 %v5035_v37, %v2089_v44 }
 0x302   : > { %v2163_v35 = vpack.c.bf16 %v5104_v53, %v5101_v26  ;;  %v4087_v26 = vld [vmem:[%s5569_s9 + $0x8] sm:$0xff]  }
 0x303   : > { %v2162_v9 = vpack.c.bf16 %v5110_v3, %v5107_v30  ;;  %v3849_v52 = vpop.f32.mrb[52].mxu1 }
 0x304   : > { %v2094_v16 = vmul.f32 %v3849_v52, %v5029_v13  ;;  %v2005_v23 = vpop.f32.mrb[53].mxu1 }
 0x305   : > { %v2092_v60 = vmul.f32 %v5029_v13, %v2005_v23  ;;  %v3850_v2 = vpop.f32.mrb[54].mxu1 }
 0x306   : > { %v2095_v6 = vmul.f32 %v3850_v2, %v5029_v13  ;;  %v2008_v22 = vpop.f32.mrb[55].mxu1  ;;  %v2134_v15 = vadd.f32 %v5035_v37, %v2094_v16 }
 0x307   : > { %v2093_v33 = vmul.f32 %v5029_v13, %v2008_v22  ;;  %v2132_v41 = vadd.f32 %v5035_v37, %v2092_v60 }
 0x308   : > { %v2135_v54 = vadd.f32 %v5035_v37, %v2095_v6 }
 0x309   : > { %v2133_v25 = vadd.f32 %v5035_v37, %v2093_v33 }
 0x30a   : > { %v2165_v43 = vpack.c.bf16 %v2135_v54, %v2134_v15 }
 0x30b   : > { %v3853_v17 = vpop.f32.mrb[56].mxu1  ;;  %v2164_v14 = vpack.c.bf16 %v2133_v25, %v2132_v41 }
 0x30c   : > { %v2098_v21 = vmul.f32 %v3853_v17, %v5029_v13  ;;  %v2021_v58 = vpop.f32.mrb[57].mxu1 }
 0x30d   : > { %v2096_v4 = vmul.f32 %v5029_v13, %v2021_v58  ;;  %v3854_v56 = vpop.f32.mrb[58].mxu1  ;;  %3654 = vmatprep.subr.bf16.mxu0 %v2164_v14 }
 0x30e   : > { %v2099_v12 = vmul.f32 %v3854_v56, %v5029_v13  ;;  %v2024_v5 = vpop.f32.mrb[59].mxu1  ;;  %3655 = vmatpush3.bf16.msra.mxu0 %v2156_v38  ;;  %v2138_v59 = vadd.f32 %v5035_v37, %v2098_v21 }
 0x30f   : > { %v2097_v10 = vmul.f32 %v5029_v13, %v2024_v5  ;;  %3656 = vmatprep.subr.bf16.mxu0 %v2165_v43  ;;  %v2136_v18 = vadd.f32 %v5035_v37, %v2096_v4 }
 0x310   : > { %v2139_v47 = vadd.f32 %v5035_v37, %v2099_v12 }
 0x311   : > { %v2137_v62 = vadd.f32 %v5035_v37, %v2097_v10 }
 0x312   : > { %3657 = vmatpush3.bf16.msra.mxu0 %v2157_v36  ;;  %v2167_v11 = vpack.c.bf16 %v2139_v47, %v2138_v59 }
 0x313   : > { %v3857_v19 = vpop.f32.mrb[60].mxu1  ;;  %v2166_v1 = vpack.c.bf16 %v2137_v62, %v2136_v18 }
 0x314   : > { %v2102_v57 = vmul.f32 %v3857_v19, %v5029_v13  ;;  %v2037_v42 = vpop.f32.mrb[61].mxu1 }
 0x315   : > { %v2100_v38 = vmul.f32 %v5029_v13, %v2037_v42  ;;  %v3858_v63 = vpop.f32.mrb[62].mxu1  ;;  %3658 = vmatprep.subr.bf16.mxu0 %v2166_v1 }
 0x316   : > { %v2103_v32 = vmul.f32 %v3858_v63, %v5029_v13  ;;  %v2040_v24 = vpop.f32.mrb[63].mxu1  ;;  %3659 = vmatpush3.bf16.msra.mxu0 %v2158_v55  ;;  %v2142_v34 = vadd.f32 %v5035_v37, %v2102_v57 }
 0x317   : > { %v2101_v31 = vmul.f32 %v5029_v13, %v2040_v24  ;;  %3660 = vmatprep.subr.bf16.mxu0 %v2167_v11  ;;  %v2140_v44 = vadd.f32 %v5035_v37, %v2100_v38 }
 0x318   : > { %v2143_v36 = vadd.f32 %v5035_v37, %v2103_v32 }
 0x319   : > { %v2141_v52 = vadd.f32 %v5035_v37, %v2101_v31 }
 0x31a   : > { %3661 = vmatpush3.bf16.msra.mxu0 %v2159_v50  ;;  %v2169_v16 = vpack.c.bf16 %v2143_v36, %v2142_v34 }
 0x31b   : > { %v3861_v23 = vpop.f32.mrb[64].mxu1  ;;  %v2168_v60 = vpack.c.bf16 %v2141_v52, %v2140_v44 }
 0x31c   : > { %v2106_v46 = vmul.f32 %v3861_v23, %v5029_v13  ;;  %v2053_v20 = vpop.f32.mrb[65].mxu1 }
 0x31d   : > { %v2104_v55 = vmul.f32 %v5029_v13, %v2053_v20  ;;  %v3862_v2 = vpop.f32.mrb[66].mxu1  ;;  %3662 = vmatprep.subr.bf16.mxu0 %v2168_v60  ;;  %v4088_v60 = vld [vmem:[%s5572_s12] sm:$0xff]   ;;  %v4090_v20 = vld [vmem:[%s5572_s12 + $0x10] sm:$0xff]  }
 0x31e   : > { %v2107_v6 = vmul.f32 %v3862_v2, %v5029_v13  ;;  %v2056_v22 = vpop.f32.mrb[67].mxu1  ;;  %3663 = vmatpush3.bf16.msra.mxu0 %v2160_v27  ;;  %v2146_v48 = vadd.f32 %v5035_v37, %v2106_v46  ;;  %v4086_v27 = vld [vmem:[%s5569_s9] sm:$0xff]   ;;  %v4089_v46 = vld [vmem:[%s5572_s12 + $0x8] sm:$0xff]  }
 0x31f   : > { %v2105_v45 = vmul.f32 %v5029_v13, %v2056_v22  ;;  %3664 = vmatprep.subr.bf16.mxu0 %v2169_v16  ;;  %v2144_v33 = vadd.f32 %v5035_v37, %v2104_v55  ;;  %v4074_v13 = vld [vmem:[%s5626_s7] ss:$8 sps:$4 sm:$0xff]   ;;  %v4091_v55 = vld [vmem:[%s5572_s12 + $0x18] sm:$0xff]  }
 0x320   : > { %v2147_v50 = vadd.f32 %v5035_v37, %v2107_v6  ;;  %v4092_v2 = vld [vmem:[%s5572_s12 + $0x20] sm:$0xff]  }
 0x321   : > { %v2145_v15 = vadd.f32 %v5035_v37, %v2105_v45  ;;  %v4077_v37 = vld [vmem:[%s5626_s7 + $0x14] ss:$8 sps:$4 sm:$0xff]   ;;  %3891 = vmatprep.subr.bf16.mxu1 %v4092_v2  ;;  %v3509_v6 = vld [vmem:[%s5570_s10] ss:$0 sm:$0xff] }
 0x322   : > { %3665 = vmatpush3.bf16.msra.mxu0 %v2161_v40  ;;  %v2171_v54 = vpack.c.bf16 %v2147_v50, %v2146_v48  ;;  %v4085_v40 = vld [vmem:[%s5626_s7 + $0x30] ss:$8 sps:$4 sm:$0xff]   ;;  %3892 = vmatpush3.bf16.msra.mxu1 %v4092_v2  ;;  %v3510_v45 = vld [vmem:[%s5571_s11] ss:$0 sm:$0xff] }
 0x323   : > { %v2170_v41 = vpack.c.bf16 %v2145_v15, %v2144_v33 }
 0x325   : > { %3666 = vmatprep.subr.bf16.mxu0 %v2170_v41 }
 0x326   : > { %3667 = vmatpush3.bf16.msra.mxu0 %v2162_v9 }
 0x327   : > { %3668 = vmatprep.subr.bf16.mxu0 %v2171_v54 }
 0x32a   : > { %3669 = vmatpush3.bf16.msra.mxu0 %v2163_v35 }
 0x32b   : > { %3863 = vmatprep.subr.bf16.mxu0 %v4086_v27 }
 0x32d   : > { %2245 = vmatmul.mubr.bf16.vlgmr.msra.gmra.mrb[28].mxu0 %v4074_v13 }
 0x32e   : > { %2252 = vmatprep.mubr.bf16.mxu0 %v4077_v37  ;;  %3864 = vmatpush3.bf16.msra.mxu0 %v4086_v27 }
 0x32f   : > { %3865 = vmatprep.subr.bf16.mxu0 %v4087_v26 }
 0x332   : > { %3866 = vmatpush3.bf16.msra.mxu0 %v4087_v26 }
 0x333   : > { %3875 = vmatprep.subr.bf16.mxu0 %v4088_v60 }
 0x335   : > { %2253 = vmatmul.mubr.bf16.gmra.mrb[32].mxu0 %v4079_v39 }
 0x336   : > { %2260 = vmatprep.mubr.bf16.mxu0 %v4080_v61 }
 0x33d   : > { %2261 = vmatmul.mubr.bf16.gmra.mrb[36].mxu0 %v4082_v51 }
 0x33e   : > { %2268 = vmatprep.mubr.bf16.mxu0 %v4083_v0 }
 0x345   : > { %2269 = vmatmul.mubr.bf16.gmra.mrb[40].mxu0 %v4085_v40 }
 0x400   : > { %v3670_v53 = vpop.f32.mrb[28].mxu0 }
 0x401   : > { %v3671_v30 = vpop.f32.mrb[29].mxu0 }
 0x402   : > { %v3672_v3 = vadd.f32 %v3671_v30, %v3670_v53  ;;  %v3673_v35 = vpop.f32.mrb[30].mxu0 }
 0x403   : > { %v3674_v9 = vpop.f32.mrb[31].mxu0 }
 0x404   : > { %v3675_v25 = vadd.f32 %v3674_v9, %v3673_v35  ;;  %v2277_v43 = vmax.f32 %v3672_v3, 0.0 }
 0x406   : > { %v2278_v17 = vmax.f32 %v3675_v25, 0.0 }
 0x408   : > { %v2285_v14 = vpack.c.bf16 %v2278_v17, %v2277_v43  ;;  %v3676_v21 = vpop.f32.mrb[32].mxu0 }
 0x409   : > { %v3677_v58 = vpop.f32.mrb[33].mxu0 }
 0x40a   : > { %v3678_v4 = vadd.f32 %v3677_v58, %v3676_v21  ;;  %v3679_v56 = vpop.f32.mrb[34].mxu0  ;;  %3867 = vmatprep.mubr.msk.bf16.mxu0 %vm1343_vm2, %v2285_v14 }
 0x40b   : > { %v3680_v12 = vpop.f32.mrb[35].mxu0 }
 0x40c   : > { %v3681_v5 = vadd.f32 %v3680_v12, %v3679_v56  ;;  %v2279_v10 = vmax.f32 %v3678_v4, 0.0 }
 0x40e   : > { %v2280_v59 = vmax.f32 %v3681_v5, 0.0 }
 0x410   : > { %v2286_v47 = vpack.c.bf16 %v2280_v59, %v2279_v10  ;;  %v3682_v18 = vpop.f32.mrb[36].mxu0 }
 0x411   : > { %v3683_v62 = vpop.f32.mrb[37].mxu0 }
 0x412   : > { %3868 = vmatmul.mubr.msk.bf16.vlgmr.msra.gmra.mrb[44].mxu0 %vm1343_vm2, %v2286_v47  ;;  %v3684_v11 = vadd.f32 %v3683_v62, %v3682_v18  ;;  %v3685_v19 = vpop.f32.mrb[38].mxu0 }
 0x413   : > { %v3686_v1 = vpop.f32.mrb[39].mxu0  ;;  %3876 = vmatpush3.bf16.msra.mxu0 %v4088_v60 }
 0x414   : > { %v3687_v57 = vadd.f32 %v3686_v1, %v3685_v19  ;;  %v2281_v42 = vmax.f32 %v3684_v11, 0.0  ;;  %3877 = vmatprep.subr.bf16.mxu0 %v4089_v46 }
 0x416   : > { %v2282_v38 = vmax.f32 %v3687_v57, 0.0 }
 0x417   : > { %3878 = vmatpush3.bf16.msra.mxu0 %v4089_v46 }
 0x418   : > { %v2287_v63 = vpack.c.bf16 %v2282_v38, %v2281_v42  ;;  %v3688_v32 = vpop.f32.mrb[40].mxu0  ;;  %3879 = vmatprep.subr.bf16.mxu0 %v4090_v20 }
 0x419   : > { %v3689_v24 = vpop.f32.mrb[41].mxu0 }
 0x41a   : > { %v3690_v31 = vadd.f32 %v3689_v24, %v3688_v32  ;;  %v3691_v34 = vpop.f32.mrb[42].mxu0  ;;  %3871 = vmatprep.mubr.msk.bf16.mxu0 %vm1343_vm2, %v2287_v63 }
 0x41b   : > { %v3692_v36 = vpop.f32.mrb[43].mxu0  ;;  %3880 = vmatpush3.bf16.msra.mxu0 %v4090_v20 }
 0x41c   : > { %v3693_v44 = vadd.f32 %v3692_v36, %v3691_v34  ;;  %v2283_v52 = vmax.f32 %v3690_v31, 0.0  ;;  %3881 = vmatprep.subr.bf16.mxu0 %v4091_v55 }
 0x41e   : > { %v2284_v16 = vmax.f32 %v3693_v44, 0.0 }
 0x41f   : > { %3882 = vmatpush3.bf16.msra.mxu0 %v4091_v55 }
 0x420   : > { %v2288_v23 = vpack.c.bf16 %v2284_v16, %v2283_v52 }
 0x422   : > { %3872 = vmatmul.mubr.msk.bf16.gmra.mrb[48].mxu0 %vm1343_vm2, %v2288_v23 }
 0x4e5   : > { %v3869_v22 = vpop.f32.mrb[44].mxu0 }
 0x4e6   : > { %v2391_v48 = vmul.f32 %v3869_v22, %v3509_v6  ;;  %v2351_v50 = vpop.f32.mrb[45].mxu0 }
 0x4e7   : > { %v2389_v33 = vmul.f32 %v3509_v6, %v2351_v50  ;;  %v3870_v15 = vpop.f32.mrb[46].mxu0  ;;  %v4094_v50 = vld [vmem:[%s5572_s12 + $0x30] sm:$0xff]  }
 0x4e8   : > { %v5224_v54 = vadd.f32 %v3510_v45, %v2391_v48  ;;  %v2392_v41 = vmul.f32 %v3870_v15, %v3509_v6  ;;  %v2354_v13 = vpop.f32.mrb[47].mxu0  ;;  %v4093_v48 = vld [vmem:[%s5572_s12 + $0x28] sm:$0xff]   ;;  %v3519_v15 = vld [vmem:[%s5573_s13] ss:$0 sm:$0xff] }
 0x4e9   : > { %v5226_v37 = vadd.f32 %v3510_v45, %v2389_v33  ;;  %v2390_v39 = vmul.f32 %v3509_v6, %v2354_v13  ;;  %3893 = vmatprep.subr.bf16.mxu1 %v4093_v48  ;;  %v4095_v33 = vld [vmem:[%s5572_s12 + $0x38] sm:$0xff]   ;;  %v5291_v13 = vld [vmem:[%s5574_s14] ss:$0 sm:$0xff] }
 0x4ea   : > { %v2414_v61 = vmul.f32 %v5224_v54, %v4473_v28  ;;  %v2422_v51 = vmul.f32 %v5224_v54, %v4475_v29  ;;  %v5232_v0 = vadd.f32 %v3510_v45, %v2392_v41  ;;  %3894 = vmatpush3.bf16.msra.mxu1 %v4093_v48 }
 0x4eb   : > { %v2412_v40 = vmul.f32 %v5226_v37, %v4473_v28  ;;  %v2420_v27 = vmul.f32 %v5226_v37, %v4475_v29  ;;  %v5238_v26 = vadd.f32 %v3510_v45, %v2390_v39  ;;  %3895 = vmatprep.subr.bf16.mxu1 %v4094_v50 }
 0x4ec   : > { %v2430_v53 = vadd.f32 %v2422_v51, %v2414_v61  ;;  %v2415_v30 = vmul.f32 %v5232_v0, %v4473_v28  ;;  %v2423_v3 = vmul.f32 %v5232_v0, %v4475_v29  ;;  %v2590_v61 = vmul.f32 %v5224_v54, %v4767_v7 }
 0x4ed   : > { %v2413_v35 = vmul.f32 %v5238_v26, %v4473_v28  ;;  %v2421_v9 = vmul.f32 %v5238_v26, %v4475_v29  ;;  %v2428_v25 = vadd.f32 %v2420_v27, %v2412_v40  ;;  %v2598_v51 = vmul.f32 %v5224_v54, %v4769_v8 }
 0x4ee   : > { %v2431_v43 = vadd.f32 %v2423_v3, %v2415_v30  ;;  %v2438_v14 = vmax.f32 %v2430_v53, 0.0  ;;  %3896 = vmatpush3.bf16.msra.mxu1 %v4094_v50  ;;  %v2588_v53 = vmul.f32 %v5226_v37, %v4767_v7  ;;  %v2596_v30 = vmul.f32 %v5226_v37, %v4769_v8 }
 0x4ef   : > { %v2429_v17 = vadd.f32 %v2421_v9, %v2413_v35  ;;  %v2436_v58 = vmax.f32 %v2428_v25, 0.0  ;;  %3897 = vmatprep.subr.bf16.mxu1 %v4095_v33  ;;  %v2591_v25 = vmul.f32 %v5232_v0, %v4767_v7  ;;  %v2597_v37 = vmul.f32 %v5238_v26, %v4769_v8 }
 0x4f0   : > { %v2439_v21 = vmax.f32 %v2431_v43, 0.0  ;;  %v2599_v43 = vmul.f32 %v5232_v0, %v4769_v8 }
 0x4f1   : > { %v2437_v4 = vmax.f32 %v2429_v17, 0.0 }
 0x4f2   : > { %v2445_v56 = vpack.c.bf16 %v2439_v21, %v2438_v14  ;;  %3898 = vmatpush3.bf16.msra.mxu1 %v4095_v33  ;;  %v2589_v21 = vmul.f32 %v5238_v26, %v4767_v7 }
 0x4f3   : > { %v2444_v12 = vpack.c.bf16 %v2437_v4, %v2436_v58  ;;  %v2606_v58 = vadd.f32 %v2598_v51, %v2590_v61 }
 0x4f5   : > { %v3873_v5 = vpop.f32.mrb[48].mxu0  ;;  %3883 = vmatprep.mubr.msk.bf16.mxu0 %vm2480_vm3, %v2444_v12  ;;  %v2604_v12 = vadd.f32 %v2596_v30, %v2588_v53 }
 0x4f6   : > { %v2395_v10 = vmul.f32 %v3873_v5, %v3509_v6  ;;  %v2367_v59 = vpop.f32.mrb[49].mxu0  ;;  %3884 = vmatmul.mubr.msk.bf16.vlgmr.msra.gmra.mrb[52].mxu0 %vm2480_vm3, %v2445_v56 }
 0x4f7   : > { %v2393_v47 = vmul.f32 %v3509_v6, %v2367_v59  ;;  %v3874_v18 = vpop.f32.mrb[50].mxu0  ;;  %v2607_v59 = vadd.f32 %v2599_v43, %v2591_v25 }
 0x4f8   : > { %v5250_v62 = vadd.f32 %v3510_v45, %v2395_v10  ;;  %v2396_v11 = vmul.f32 %v3874_v18, %v3509_v6  ;;  %v2370_v19 = vpop.f32.mrb[51].mxu0 }
 0x4f9   : > { %v5252_v1 = vadd.f32 %v3510_v45, %v2393_v47  ;;  %v2394_v57 = vmul.f32 %v3509_v6, %v2370_v19 }
 0x4fa   : > { %v2418_v42 = vmul.f32 %v5250_v62, %v4473_v28  ;;  %v2426_v38 = vmul.f32 %v5250_v62, %v4475_v29  ;;  %v5258_v63 = vadd.f32 %v3510_v45, %v2396_v11  ;;  %v2605_v11 = vadd.f32 %v2597_v37, %v2589_v21 }
 0x4fb   : > { %v2416_v32 = vmul.f32 %v5252_v1, %v4473_v28  ;;  %v2424_v24 = vmul.f32 %v5252_v1, %v4475_v29  ;;  %v5264_v31 = vadd.f32 %v3510_v45, %v2394_v57 }
 0x4fc   : > { %v2419_v34 = vmul.f32 %v5258_v63, %v4473_v28  ;;  %v2427_v36 = vmul.f32 %v5258_v63, %v4475_v29  ;;  %v2434_v44 = vadd.f32 %v2426_v38, %v2418_v42 }
 0x4fd   : > { %v2417_v52 = vmul.f32 %v5264_v31, %v4473_v28  ;;  %v2425_v16 = vmul.f32 %v5264_v31, %v4475_v29  ;;  %v2432_v23 = vadd.f32 %v2424_v24, %v2416_v32 }
 0x4fe   : > { %v2435_v60 = vadd.f32 %v2427_v36, %v2419_v34  ;;  %v2442_v20 = vmax.f32 %v2434_v44, 0.0 }
 0x4ff   : > { %v2433_v46 = vadd.f32 %v2425_v16, %v2417_v52  ;;  %v2440_v2 = vmax.f32 %v2432_v23, 0.0  ;;  %v2594_v16 = vmul.f32 %v5250_v62, %v4767_v7  ;;  %v2602_v23 = vmul.f32 %v5250_v62, %v4769_v8 }
 0x500   : > { %v2443_v55 = vmax.f32 %v2435_v60, 0.0  ;;  %v2603_v62 = vmul.f32 %v5258_v63, %v4769_v8 }
 0x501   : > { %v2441_v6 = vmax.f32 %v2433_v46, 0.0 }
 0x502   : > { %v2447_v22 = vpack.c.bf16 %v2443_v55, %v2442_v20  ;;  %v2592_v20 = vmul.f32 %v5252_v1, %v4767_v7  ;;  %v2600_v55 = vmul.f32 %v5252_v1, %v4769_v8  ;;  %v2601_v1 = vmul.f32 %v5264_v31, %v4769_v8 }
 0x503   : > { %v2446_v45 = vpack.c.bf16 %v2441_v6, %v2440_v2 }
 0x505   : > { %3887 = vmatprep.mubr.msk.bf16.mxu0 %vm2480_vm3, %v2446_v45  ;;  %v2595_v45 = vmul.f32 %v5258_v63, %v4767_v7 }
 0x506   : > { %3888 = vmatmul.mubr.msk.bf16.gmra.mrb[56].mxu0 %vm2480_vm3, %v2447_v22 }
 0x507   : > { %v2611_v30 = vadd.f32 %v2603_v62, %v2595_v45  ;;  %v4096_v62 = vld [vmem:[%s5575_s15] sm:$0xff]  }
 0x5c9   : > { %v3885_v41 = vpop.f32.mrb[52].mxu0 }
 0x5ca   : > { %v2567_v39 = vmul.f32 %v3885_v41, %v3519_v15  ;;  %v2527_v40 = vpop.f32.mrb[53].mxu0  ;;  %v2593_v41 = vmul.f32 %v5264_v31, %v4767_v7 }
 0x5cb   : > { %v2565_v27 = vmul.f32 %v3519_v15, %v2527_v40  ;;  %v3886_v3 = vpop.f32.mrb[54].mxu0  ;;  %v2608_v40 = vadd.f32 %v2600_v55, %v2592_v20 }
 0x5cc   : > { %v2582_v35 = vadd.f32 %v5291_v13, %v2567_v39  ;;  %v2568_v9 = vmul.f32 %v3886_v3, %v3519_v15  ;;  %v2530_v17 = vpop.f32.mrb[55].mxu0  ;;  %v2610_v39 = vadd.f32 %v2602_v23, %v2594_v16 }
 0x5cd   : > { %v2580_v54 = vadd.f32 %v5291_v13, %v2565_v27  ;;  %v2566_v14 = vmul.f32 %v3519_v15, %v2530_v17 }
 0x5ce   : > { %v2614_v4 = vmul.f32 %v2582_v35, %v4802_v49  ;;  %v2583_v56 = vadd.f32 %v5291_v13, %v2568_v9  ;;  %v2609_v35 = vadd.f32 %v2601_v1, %v2593_v41  ;;  %v4102_v41 = vld [vmem:[%s5579_s19 + $0x8] sm:$0xff]   ;;  %v4103_v1 = vld [vmem:[%s5579_s19 + $0x10] sm:$0xff]  }
 0x5cf   : > { %v2612_v5 = vmul.f32 %v2580_v54, %v4802_v49  ;;  %v2581_v0 = vadd.f32 %v5291_v13, %v2566_v14 }
 0x5d0   : > { %v2622_v10 = vadd.f32 %v2614_v4, %v2606_v58  ;;  %v2615_v47 = vmul.f32 %v2583_v56, %v4802_v49  ;;  %v4097_v58 = vld [vmem:[%s5576_s16] sm:$0xff]   ;;  %v4098_v4 = vld [vmem:[%s5576_s16 + $0x8] sm:$0xff]  }
 0x5d1   : > { %v2620_v18 = vadd.f32 %v2612_v5, %v2604_v12  ;;  %v2613_v19 = vmul.f32 %v2581_v0, %v4802_v49  ;;  %v3538_v56 = vld [vmem:[%s5573_s13 + $0x1] ss:$0 sm:$0xff] }
 0x5d2   : > { %v2623_v57 = vadd.f32 %v2615_v47, %v2607_v59  ;;  %v2630_v42 = vmax.f32 %v2622_v10, 0.0  ;;  %v3540_v10 = vld [vmem:[%s5574_s14 + $0x1] ss:$0 sm:$0xff] }
 0x5d3   : > { %v2621_v26 = vadd.f32 %v2613_v19, %v2605_v11  ;;  %v2628_v32 = vmax.f32 %v2620_v18, 0.0 }
 0x5d4   : > { %v2631_v38 = vmax.f32 %v2623_v57, 0.0 }
 0x5d5   : > { %v2629_v24 = vmax.f32 %v2621_v26, 0.0 }
 0x5d6   : > { %v2637_v34 = vpack.c.bf16 %v2631_v38, %v2630_v42 }
 0x5d7   : > { %v2636_v36 = vpack.c.bf16 %v2629_v24, %v2628_v32 }
 0x5d9   : > { %v3889_v44 = vpop.f32.mrb[56].mxu0  ;;  %3899 = vmatprep.mubr.msk.bf16.mxu1 %vm2480_vm3, %v2636_v36 }
 0x5da   : > { %v2571_v52 = vmul.f32 %v3889_v44, %v3519_v15  ;;  %v2543_v60 = vpop.f32.mrb[57].mxu0  ;;  %3900 = vmatmul.mubr.msk.bf16.vlgmr.msra.gmra.mrb[68].mxu1 %vm2480_vm3, %v2637_v34 }
 0x5db   : > { %v2569_v46 = vmul.f32 %v3519_v15, %v2543_v60  ;;  %v3890_v2 = vpop.f32.mrb[58].mxu0 }
 0x5dc   : > { %v2586_v6 = vadd.f32 %v5291_v13, %v2571_v52  ;;  %v2572_v22 = vmul.f32 %v3890_v2, %v3519_v15  ;;  %v2546_v48 = vpop.f32.mrb[59].mxu0 }
 0x5dd   : > { %v2584_v50 = vadd.f32 %v5291_v13, %v2569_v46  ;;  %v2570_v33 = vmul.f32 %v3519_v15, %v2546_v48  ;;  %v4099_v48 = vld [vmem:[%s5576_s16 + $0x10] sm:$0xff]  }
 0x5de   : > { %v2618_v61 = vmul.f32 %v2586_v6, %v4802_v49  ;;  %v2587_v51 = vadd.f32 %v5291_v13, %v2572_v22 }
 0x5df   : > { %v2616_v27 = vmul.f32 %v2584_v50, %v4802_v49  ;;  %v2585_v63 = vadd.f32 %v5291_v13, %v2570_v33  ;;  %v4209_v13 = vmov 0.0   ;;  %v4100_v50 = vld [vmem:[%s5576_s16 + $0x18] sm:$0xff]   ;;  %v4101_v33 = vld [vmem:[%s5579_s19] sm:$0xff]  }
 0x5e0   : > { %v2626_v53 = vadd.f32 %v2618_v61, %v2610_v39  ;;  %v2619_v15 = vmul.f32 %v2587_v51, %v4802_v49  ;;  %3907 = vmatprep.subr.bf16.mxu0 %v4209_v13  ;;  %3919 = vmatprep.subr.bf16.mxu1 %v4209_v13  ;;  %v4104_v39 = vld [vmem:[%s5579_s19 + $0x18] sm:$0xff]  }
 0x5e1   : > { %v2624_v3 = vadd.f32 %v2616_v27, %v2608_v40  ;;  %v2617_v9 = vmul.f32 %v2585_v63, %v4802_v49  ;;  %3915 = vmatprep.mubr.msk.bf16.mxu0 %vm4210_vm4, %v4209_v13  ;;  %3920 = vmatpush3.bf16.msra.mxu1 %v4097_v58 }
 0x5e2   : > { %v2627_v25 = vadd.f32 %v2619_v15, %v2611_v30  ;;  %v2634_v43 = vmax.f32 %v2626_v53, 0.0  ;;  %3921 = vmatprep.subr.bf16.mxu1 %v4209_v13  ;;  %v4105_v15 = vld [vmem:[%s5579_s19 + $0x20] sm:$0xff]  }
 0x5e3   : > { %v2625_v31 = vadd.f32 %v2617_v9, %v2609_v35  ;;  %v2632_v54 = vmax.f32 %v2624_v3, 0.0  ;;  %v4106_v3 = vld [vmem:[%s5579_s19 + $0x28] sm:$0xff]   ;;  %v4107_v35 = vld [vmem:[%s5579_s19 + $0x30] sm:$0xff]   ;;  %v4108_v9 = vld [vmem:[%s5579_s19 + $0x38] sm:$0xff]  }
 0x5e4   : > { %v2635_v17 = vmax.f32 %v2627_v25, 0.0  ;;  %v4109_v25 = vld [vmem:[%s5579_s19 + $0x40] sm:$0xff]  }
 0x5e5   : > { %v2633_v14 = vmax.f32 %v2625_v31, 0.0  ;;  %3922 = vmatpush3.bf16.msra.mxu1 %v4098_v4  ;;  %v4110_v31 = vld [vmem:[%s5579_s19 + $0x48] sm:$0xff]  }
 0x5e6   : > { %v2639_v21 = vpack.c.bf16 %v2635_v17, %v2634_v43  ;;  %3923 = vmatprep.subr.bf16.mxu1 %v4209_v13  ;;  %v4111_v43 = vld [vmem:[%s5579_s19 + $0x50] sm:$0xff]   ;;  %v4112_v17 = vld [vmem:[%s5579_s19 + $0x58] sm:$0xff]  }
 0x5e7   : > { %v2638_v37 = vpack.c.bf16 %v2633_v14, %v2632_v54  ;;  %v3548_v54 = vld [vmem:[%s5577_s17] ss:$0 sm:$0xff] }
 0x5e9   : > { %3903 = vmatprep.mubr.msk.bf16.mxu1 %vm2480_vm3, %v2638_v37  ;;  %3924 = vmatpush3.bf16.msra.mxu1 %v4099_v48 }
 0x5ea   : > { %3904 = vmatmul.mubr.msk.bf16.gmra.mrb[72].mxu1 %vm2480_vm3, %v2639_v21  ;;  %3925 = vmatprep.subr.bf16.mxu1 %v4209_v13  ;;  %v3549_v21 = vld [vmem:[%s5578_s18] ss:$0 sm:$0xff] }
 0x5eb   : > { %3927 = vmatprep.mubr.msk.bf16.mxu1 %vm4210_vm4, %v4209_v13 }
 0x5ed   : > { %3926 = vmatpush3.bf16.msra.mxu1 %v4100_v50 }
 0x5ee   : > { %3951 = vmatprep.subr.bf16.mxu1 %v4209_v13 }
 0x6ad   : > { %v3901_v12 = vpop.f32.mrb[68].mxu1 }
 0x6ae   : > { %v2760_v5 = vmul.f32 %v3901_v12, %v3538_v56  ;;  %v2719_v0 = vpop.f32.mrb[69].mxu1 }
 0x6af   : > { %v2758_v59 = vmul.f32 %v3538_v56, %v2719_v0  ;;  %v3902_v47 = vpop.f32.mrb[70].mxu1 }
 0x6b0   : > { %v2761_v18 = vmul.f32 %v3902_v47, %v3538_v56  ;;  %v2722_v11 = vpop.f32.mrb[71].mxu1  ;;  %v2776_v57 = vadd.f32 %v3540_v10, %v2760_v5 }
 0x6b1   : > { %v2759_v19 = vmul.f32 %v3538_v56, %v2722_v11  ;;  %v2774_v42 = vadd.f32 %v3540_v10, %v2758_v59 }
 0x6b2   : > { %v2777_v26 = vadd.f32 %v3540_v10, %v2761_v18 }
 0x6b3   : > { %v2775_v38 = vadd.f32 %v3540_v10, %v2759_v19 }
 0x6b4   : > { %v2785_v32 = vpack.c.bf16 %v2777_v26, %v2776_v57 }
 0x6b5   : > { %v2784_v24 = vpack.c.bf16 %v2775_v38, %v2774_v42  ;;  %v4113_v38 = vld [vmem:[%s5579_s19 + $0x60] sm:$0xff]  }
 0x6b7   : > { %3908 = vmatpush3.bf16.msra.mxu0 %v2784_v24  ;;  %v4118_v24 = vld [vmem:[%s5582_s22 + $0x8] sm:$0xff]  }
 0x6b8   : > { %3909 = vmatprep.subr.bf16.mxu0 %v4209_v13 }
 0x6bb   : > { %3910 = vmatpush3.bf16.msra.mxu0 %v2785_v32  ;;  %v4117_v32 = vld [vmem:[%s5582_s22] sm:$0xff]  }
 0x6bc   : > { %3911 = vmatprep.subr.bf16.mxu0 %v4209_v13 }
 0x6bd   : > { %v3905_v34 = vpop.f32.mrb[72].mxu1 }
 0x6be   : > { %v2764_v36 = vmul.f32 %v3905_v34, %v3538_v56  ;;  %v2735_v44 = vpop.f32.mrb[73].mxu1  ;;  %v4116_v34 = vld [vmem:[%s5579_s19 + $0x78] sm:$0xff]  }
 0x6bf   : > { %v2762_v52 = vmul.f32 %v3538_v56, %v2735_v44  ;;  %v3906_v16 = vpop.f32.mrb[74].mxu1 }
 0x6c0   : > { %v2765_v23 = vmul.f32 %v3906_v16, %v3538_v56  ;;  %v2738_v60 = vpop.f32.mrb[75].mxu1  ;;  %v2780_v20 = vadd.f32 %v3540_v10, %v2764_v36  ;;  %v3558_v36 = vld [vmem:[%s5580_s20] ss:$0 sm:$0xff] }
 0x6c1   : > { %v2763_v46 = vmul.f32 %v3538_v56, %v2738_v60  ;;  %v2778_v2 = vadd.f32 %v3540_v10, %v2762_v52  ;;  %v3559_v52 = vld [vmem:[%s5581_s21] ss:$0 sm:$0xff] }
 0x6c2   : > { %v2781_v55 = vadd.f32 %v3540_v10, %v2765_v23 }
 0x6c3   : > { %v2779_v6 = vadd.f32 %v3540_v10, %v2763_v46 }
 0x6c4   : > { %v2787_v22 = vpack.c.bf16 %v2781_v55, %v2780_v20 }
 0x6c5   : > { %v2786_v45 = vpack.c.bf16 %v2779_v6, %v2778_v2 }
 0x6c7   : > { %3912 = vmatpush3.bf16.msra.mxu0 %v2786_v45 }
 0x6c8   : > { %3913 = vmatprep.subr.bf16.mxu0 %v4209_v13 }
 0x6cb   : > { %3914 = vmatpush3.bf16.msra.mxu0 %v2787_v22 }
 0x6cc   : > { %3931 = vmatprep.subr.bf16.mxu0 %v4209_v13 }
 0x6ce   : > { %3916 = vmatmul.mubr.msk.bf16.vlgmr.msra.gmra.mrb[60].mxu0 %vm2480_vm3, %v4096_v62 }
 0x6cf   : > { %3947 = vmatprep.mubr.msk.bf16.mxu0 %vm4210_vm4, %v4209_v13  ;;  %3932 = vmatpush3.bf16.msra.mxu0 %v4101_v33 }
 0x6d0   : > { %3933 = vmatprep.subr.bf16.mxu0 %v4209_v13 }
 0x6d3   : > { %3934 = vmatpush3.bf16.msra.mxu0 %v4102_v41 }
 0x6d4   : > { %3935 = vmatprep.subr.bf16.mxu0 %v4209_v13 }
 0x6d7   : > { %3936 = vmatpush3.bf16.msra.mxu0 %v4103_v1 }
 0x6d8   : > { %3937 = vmatprep.subr.bf16.mxu0 %v4209_v13 }
 0x6db   : > { %3938 = vmatpush3.bf16.msra.mxu0 %v4104_v39 }
 0x6dc   : > { %3939 = vmatprep.subr.bf16.mxu0 %v4209_v13 }
 0x6df   : > { %3940 = vmatpush3.bf16.msra.mxu0 %v4105_v15 }
 0x6e0   : > { %3941 = vmatprep.subr.bf16.mxu0 %v4209_v13 }
 0x6e3   : > { %3942 = vmatpush3.bf16.msra.mxu0 %v4106_v3 }
 0x6e4   : > { %3943 = vmatprep.subr.bf16.mxu0 %v4209_v13 }
 0x6e7   : > { %3944 = vmatpush3.bf16.msra.mxu0 %v4107_v35 }
 0x6e8   : > { %3945 = vmatprep.subr.bf16.mxu0 %v4209_v13 }
 0x6eb   : > { %3946 = vmatpush3.bf16.msra.mxu0 %v4108_v9  ;;  %v3587_v9 = vld [vmem:[%s5581_s21 + $0x1] ss:$0 sm:$0xff] }
 0x6ec   : > { %3971 = vmatprep.subr.bf16.mxu0 %v4209_v13 }
 0x7a1   : > { %v2830_v61 = vpop.f32.mrb[60].mxu0 }
 0x7a2   : > { %v3917_v51 = vpop.f32.mrb[61].mxu0  ;;  %v2837_v27 = vmax.f32 %v2830_v61, 0.0 }
 0x7a3   : > { %v2833_v40 = vpop.f32.mrb[62].mxu0 }
 0x7a4   : > { %v2838_v63 = vmax.f32 %v2833_v40, 0.0  ;;  %v3918_v53 = vpop.f32.mrb[63].mxu0 }
 0x7a5   : > { %v4124_v53 = vld [vmem:[%s5582_s22 + $0x38] sm:$0xff]  }
 0x7a6   : > { %v2839_v30 = vpack.c.bf16 %v2838_v63, %v2837_v27  ;;  %v4122_v27 = vld [vmem:[%s5582_s22 + $0x28] sm:$0xff]   ;;  %v4123_v63 = vld [vmem:[%s5582_s22 + $0x30] sm:$0xff]  }
 0x7a8   : > { %3928 = vmatmul.mubr.msk.bf16.vlgmr.msra.gmra.mrb[76].mxu1 %vm2480_vm3, %v2839_v30  ;;  %v3585_v30 = vld [vmem:[%s5580_s20 + $0x1] ss:$0 sm:$0xff] }
 0x7a9   : > { %3967 = vmatprep.mubr.msk.bf16.mxu1 %vm4210_vm4, %v4209_v13  ;;  %3952 = vmatpush3.bf16.msra.mxu1 %v4109_v25 }
 0x7aa   : > { %3953 = vmatprep.subr.bf16.mxu1 %v4209_v13 }
 0x7ad   : > { %3954 = vmatpush3.bf16.msra.mxu1 %v4110_v31 }
 0x7ae   : > { %3955 = vmatprep.subr.bf16.mxu1 %v4209_v13 }
 0x7b1   : > { %3956 = vmatpush3.bf16.msra.mxu1 %v4111_v43 }
 0x7b2   : > { %3957 = vmatprep.subr.bf16.mxu1 %v4209_v13 }
 0x7b5   : > { %3958 = vmatpush3.bf16.msra.mxu1 %v4112_v17 }
 0x7b6   : > { %3959 = vmatprep.subr.bf16.mxu1 %v4209_v13 }
 0x7b9   : > { %3960 = vmatpush3.bf16.msra.mxu1 %v4113_v38 }
 0x7ba   : > { %3961 = vmatprep.subr.bf16.mxu1 %v4209_v13 }
 0x87b   : > { %v2909_v14 = vpop.f32.mrb[76].mxu1 }
 0x87c   : > { %v2923_v37 = vmul.f32 %v3548_v54, %v2909_v14  ;;  %v3929_v58 = vpop.f32.mrb[77].mxu1 }
 0x87d   : > { %v2912_v4 = vpop.f32.mrb[78].mxu1 }
 0x87e   : > { %v2932_v56 = vadd.f32 %v3549_v21, %v2923_v37  ;;  %v2924_v12 = vmul.f32 %v3548_v54, %v2912_v4  ;;  %v3930_v5 = vpop.f32.mrb[79].mxu1 }
 0x880   : > { %v2934_v0 = vmul.f32 %v2932_v56, %v4473_v28  ;;  %v2936_v10 = vmul.f32 %v2932_v56, %v4475_v29  ;;  %v2933_v59 = vadd.f32 %v3549_v21, %v2924_v12  ;;  %v3066_v23 = vmul.f32 %v2932_v56, %v4767_v7 }
 0x881   : > { %v3068_v60 = vmul.f32 %v2932_v56, %v4769_v8 }
 0x882   : > { %v2935_v47 = vmul.f32 %v2933_v59, %v4473_v28  ;;  %v2937_v18 = vmul.f32 %v2933_v59, %v4475_v29  ;;  %v2938_v11 = vadd.f32 %v2936_v10, %v2934_v0  ;;  %v4114_v28 = vld [vmem:[%s5579_s19 + $0x68] sm:$0xff]   ;;  %v4115_v29 = vld [vmem:[%s5579_s19 + $0x70] sm:$0xff]   ;;  %v3067_v6 = vmul.f32 %v2933_v59, %v4767_v7  ;;  %v3230_v0 = vld [vmem:[%s5583_s23] sm:$0x1] }
 0x883   : > { %3962 = vmatpush3.bf16.msra.mxu1 %v4114_v28  ;;  %v3069_v22 = vmul.f32 %v2933_v59, %v4769_v8  ;;  %v3070_v62 = vadd.f32 %v3068_v60, %v3066_v23  ;;  %v4119_v7 = vld [vmem:[%s5582_s22 + $0x10] sm:$0xff]   ;;  %v4120_v8 = vld [vmem:[%s5582_s22 + $0x18] sm:$0xff]  }
 0x884   : > { %v2939_v19 = vadd.f32 %v2937_v18, %v2935_v47  ;;  %v2940_v57 = vmax.f32 %v2938_v11, 0.0  ;;  %3963 = vmatprep.subr.bf16.mxu1 %v4209_v13 }
 0x885   : > { %v3071_v41 = vadd.f32 %v3069_v22, %v3067_v6 }
 0x886   : > { %v2941_v26 = vmax.f32 %v2939_v19, 0.0 }
 0x887   : > { %3964 = vmatpush3.bf16.msra.mxu1 %v4115_v29 }
 0x888   : > { %v2942_v42 = vpack.c.bf16 %v2941_v26, %v2940_v57  ;;  %3965 = vmatprep.subr.bf16.mxu1 %v4209_v13 }
 0x88a   : > { %3948 = vmatmul.mubr.bf16.vlgmr.msra.gmra.mrb[64].mxu0 %v2942_v42 }
 0x88b   : > { %3987 = vmatprep.mubr.msk.bf16.mxu0 %vm4210_vm4, %v4209_v13  ;;  %3972 = vmatpush3.bf16.msra.mxu0 %v4117_v32 }
 0x88c   : > { %3973 = vmatprep.subr.bf16.mxu0 %v4209_v13  ;;  %3966 = vmatpush3.bf16.msra.mxu1 %v4116_v34 }
 0x88f   : > { %3974 = vmatpush3.bf16.msra.mxu0 %v4118_v24 }
 0x890   : > { %3975 = vmatprep.subr.bf16.mxu0 %v4209_v13 }
 0x893   : > { %3976 = vmatpush3.bf16.msra.mxu0 %v4119_v7 }
 0x894   : > { %3977 = vmatprep.subr.bf16.mxu0 %v4209_v13 }
 0x897   : > { %3978 = vmatpush3.bf16.msra.mxu0 %v4120_v8 }
 0x898   : > { %3979 = vmatprep.subr.bf16.mxu0 %v4209_v13 }
 0x95d   : > { %v3041_v44 = vpop.f32.mrb[64].mxu0 }
 0x95e   : > { %v3055_v16 = vmul.f32 %v3558_v36, %v3041_v44  ;;  %v3949_v46 = vpop.f32.mrb[65].mxu0 }
 0x95f   : > { %v3044_v20 = vpop.f32.mrb[66].mxu0 }
 0x960   : > { %v3064_v55 = vadd.f32 %v3559_v52, %v3055_v16  ;;  %v3056_v2 = vmul.f32 %v3558_v36, %v3044_v20  ;;  %v3950_v45 = vpop.f32.mrb[67].mxu0 }
 0x962   : > { %v3072_v48 = vmul.f32 %v3064_v55, %v4802_v49  ;;  %v3065_v50 = vadd.f32 %v3559_v52, %v3056_v2 }
 0x964   : > { %v3074_v33 = vadd.f32 %v3072_v48, %v3070_v62  ;;  %v3073_v1 = vmul.f32 %v3065_v50, %v4802_v49  ;;  %v4121_v49 = vld [vmem:[%s5582_s22 + $0x20] sm:$0xff]  }
 0x965   : > { %3980 = vmatpush3.bf16.msra.mxu0 %v4121_v49 }
 0x966   : > { %v3075_v39 = vadd.f32 %v3073_v1, %v3071_v41  ;;  %v3076_v61 = vmax.f32 %v3074_v33, 0.0  ;;  %3981 = vmatprep.subr.bf16.mxu0 %v4209_v13 }
 0x968   : > { %v3077_v51 = vmax.f32 %v3075_v39, 0.0 }
 0x969   : > { %3982 = vmatpush3.bf16.msra.mxu0 %v4122_v27 }
 0x96a   : > { %v3078_v40 = vpack.c.bf16 %v3077_v51, %v3076_v61  ;;  %3983 = vmatprep.subr.bf16.mxu0 %v4209_v13 }
 0x96c   : > { %3968 = vmatmul.mubr.bf16.vlgmr.msra.gmra.mrb[80].mxu1 %v3078_v40 }
 0x96d   : > { %3984 = vmatpush3.bf16.msra.mxu0 %v4123_v63 }
 0x96e   : > { %3985 = vmatprep.subr.bf16.mxu0 %v4209_v13 }
 0x971   : > { %3986 = vmatpush3.bf16.msra.mxu0 %v4124_v53 }
 0xa3f   : > { %v3178_v15 = vpop.f32.mrb[80].mxu1 }
 0xa40   : > { %v3193_v3 = vmul.f32 %v3585_v30, %v3178_v15  ;;  %v3969_v35 = vpop.f32.mrb[81].mxu1 }
 0xa41   : > { %v3181_v25 = vpop.f32.mrb[82].mxu1 }
 0xa42   : > { %v3194_v31 = vmul.f32 %v3585_v30, %v3181_v25  ;;  %v3970_v43 = vpop.f32.mrb[83].mxu1  ;;  %v3203_v17 = vadd.f32 %v3587_v9, %v3193_v3 }
 0xa44   : > { %v3204_v54 = vadd.f32 %v3587_v9, %v3194_v31 }
 0xa46   : > { %v3205_v13 = vadd.f32 %v3204_v54, %v3203_v17 }
 0xa48   : > { %v3206_v14 = vrot.slane %v3205_v13, 4 }
 0xa4a   : > { %v3207_v21 = vadd.f32 %v3206_v14, %v3205_v13 }
 0xa4c   : > { %v3208_v37 = vrot.slane %v3207_v21, 2 }
 0xa4e   : > { %v3209_v58 = vadd.f32 %v3208_v37, %v3207_v21 }
 0xa50   : > { %v3210_v4 = vrot.slane %v3209_v58, 1 }
 0xa52   : > { %v3211_v56 = vadd.f32 %v3210_v4, %v3209_v58 }
 0xa54   : > { %v3212_v12 = vmul.f32 0.0625, %v3211_v56 }
 0xa56   : > { %v3213_v5 = vpack.c.bf16 %v3212_v12, %v3212_v12 }
 0xa58   : > { %3988 = vmatmul.mubr.bf16.vlgmr.msra.gmra.mrb[68].mxu0 %v3213_v5 }
 0xb2b   : > { %v3313_v10 = vpop.f32.mrb[68].mxu0 }
 0xb2c   : > { %v3314_v59 = vadd.f32 %v3313_v10, %v3230_v0  ;;  %v3989_v47 = vpop.f32.mrb[69].mxu0 }
 0xb2d   : > { %v3316_v18 = vpop.f32.mrb[70].mxu0 }
 0xb2e   : > { %3319 = vst [vmem:[%s744_s2] sm:$0x1] %v3314_v59  ;;  %v3990_v11 = vpop.f32.mrb[71].mxu0 }
 0xb2f   : > { %4153 = shalt.err (!%p4150_p2)
}
 0xb30   : > { %s4154_s4 = scalar_lea.hbm %s5518_s0, 16  ;;  %s4158_s29 = scalar_lea.hbm %s5584_s24, 32 }
 0xb31   : > { %p4155_p3 = scmp.ne.s32.totalorder %s5518_s0, %s4154_s4  ;;  %p4159_p8 = scmp.lt.u32.totalorder %s5518_s0, %s5584_s24 }
 0xb32   : > { %p4160_p11 = scmp.lt.u32.totalorder %s4158_s29, %s4154_s4  ;;  %p4162_p10 = scmp.lt.u32.totalorder %s4154_s4, %s5518_s0 }
 0xb33   : > { %p4156_p4 = pnand %p4155_p3, %p4375_p5 }
 0xb34   : > { %p4161_p9 = por %p4160_p11, %p4159_p8 }
 0xb35   : > { %p4157_p7 = pneg %p4156_p4 }
 0xb36   : > { %p4163_p12 = por %p4162_p10, %p4161_p9 }
 0xb38   : > { %p4164_p13 = pnand %p4163_p12, %p4157_p7 }
 0xb3a   : > { %4167 = shalt.err (!%p4164_p13)
}
 0xb3b   : > { %4003 = dma.vmem_to_hbm [thread:$0]  (%p4375_p5), %s5520_s1, 16, %s5518_s0, %s3321_s8  }
 0xb3c PF: > { %s5627_s6 = sld [smem:[#allocation8_spill]]  ;;  %p4015_p0 = scmp.ge.s32.totalorder %s4206_s28, 2 }
 0xb3e   : > { %p4010_p1 = pnand %p4015_p0, %p4379_p6 }
 0xb42   : > { %s3345_s25 = sand.u32 1, %s5627_s6  }
 0xb43   : > { %s3346_s2 = scalar_lea.sflag [#allocation3], %s3345_s25 }
 0xb44   : > { %4189 = dma.done.wait (!%p4010_p1), %s3346_s2, 16  }
 0xb45   : > { %4191 = vsyncadd (!%p4010_p1), %s3346_s2, 4294967280  ;;  %s5629_s28 = sld [smem:[#allocation10_spill]]  ;;  %s5630_s4 = sld [smem:[#allocation9_spill]] }
 0xb46   : > { %s5631_s27 = sld [smem:[#allocation11_spill]]  ;;  %s5632_s5 = smov %s4198_s26 }
 0xb4b   : > { %p35_p2 = scmp.ge.s32.totalorder %s5629_s28, 4   ;;  %s5633_s26 = smov %s5630_s4 }
 0xb4d   :  { %37 = sbr.rel (!%p35_p2) target bundleno = 14 (0xe), region = 165 }
 0xb54   :  { %3350 = vsyncpa [#allocation3], 1 }
 0xb55   :  { %3352 = vsyncpa [#allocation3 + $0x1], 1 }
 0xb56   :  { %3353 = vsyncpa [#allocation4], 1 }
 0xb57   :  { %3355 = vsyncpa [#allocation4 + $0x1], 1 }

</bundles_post_ra>
